<compile_context>
chip_gen: v6e
topology: v6e:2x2x1
jax: 0.10.0
libtpu: 0.0.40
codegen_flags: <defaults>
</compile_context>

<pallas_src>
import jax
import jax.numpy as jnp
from jax.experimental import pallas as pl
from jax.experimental.pallas import tpu as pltpu

# ---- small shapes consistent with the module (scaled down from 3x224x224) ----
N = 2                       # batch
C_IN, C_OUT = 3, 64         # conv1: Conv2d(3, 64, k=3, pad=1)
H = W = 16                  # spatial (module assumes 224; we use a small size)
HP, WP = H // 2, W // 2     # after MaxPool2d(2, 2)
S = HP * WP                 # pooled spatial positions (64)
EMBEDDING_DIM = 256         # fc1 output
FC2_OUT = 256               # fc2 output
FLAT = C_OUT * S            # fc1 input features (4096)
TAPS = 9 * C_IN             # 3x3xC_IN im2col feature size = 27
TAPS_PAD = 32               # padded so conv K dim is packing/sublane aligned

G = 8                       # pooled positions folded into lanes per conv matmul
NGROUPS = S // G            # 8 position groups total
TS = 32                     # pooled positions per grid step -> fc1 K tile = 2048
GROUPS_PER_STEP = TS // G   # 4 conv/fc1 dots per step
NCHUNK = S // TS            # 2 grid steps (keep >=2 so w1 DMA overlaps MXU on v5e)


# --------------------------- fused Pallas kernel ------------------------------
def fused_kernel(p_ref, wcbd_ref, bcbd_ref, w1_ref, b1_ref, w2_ref, b2_ref,
                 o_ref, acc_ref):
    """One grid step = TS pooled positions (whole batch), split into 4 lane-dense groups.

    p_ref:    (GROUPS_PER_STEP, 4*N, G*TAPS_PAD) bf16 im2col patches,
              rows = pool_offset*N + n, cols = pos_in_group*TAPS_PAD + tap
    wcbd_ref: (G*TAPS_PAD, G*C_OUT)   bf16 block-diagonal conv weight (kron(I_G, wc))
    bcbd_ref: (1, G*C_OUT)            f32 conv bias tiled G times along lanes
    w1_ref:   (GROUPS_PER_STEP, G*C_OUT, EMB) bf16 fc1 weight slice for this chunk
    b1_ref:   (1, EMB)  f32 | w2_ref: (EMB, FC2) bf16 | b2_ref: (1, FC2) f32
    o_ref:    (N, FC2)  output (written on the last step only)
    acc_ref:  (N, EMB)  f32 VMEM accumulator, carried across grid steps
    """
    g = pl.program_id(0)

    @pl.when(g == 0)
    def _init():
        acc_ref[...] = jnp.zeros_like(acc_ref)

    wcbd = wcbd_ref[...]                                   # hoisted: resident constant
    bcbd = bcbd_ref[...]

    partial = jnp.zeros((N, EMBEDDING_DIM), jnp.float32)
    for q in range(GROUPS_PER_STEP):
        # Conv for G pooled positions x 4 pool offsets x batch as ONE matmul.
        # Block-diagonal weight keeps (position, channel) together in lanes (512-wide).
        y = jnp.dot(p_ref[q], wcbd,
                    preferred_element_type=jnp.float32)    # (4*N, G*C_OUT)
        # 2x2 max-pool over the 4 pool-offset row groups; bias + ReLU after the max
        # (valid: bias is identical across candidates, ReLU is monotone).
        pooled = jnp.maximum(jnp.maximum(y[0 * N:1 * N], y[1 * N:2 * N]),
                             jnp.maximum(y[2 * N:3 * N], y[3 * N:4 * N]))  # (N, G*C_OUT)
        pooled = jnp.maximum(pooled + bcbd, 0.0)
        # fc1 partial: contract the (position, channel) lane dim against the matching
        # w1 slice — a single K=512 dot per group (no per-position tiny dots).
        partial += jnp.dot(pooled.astype(jnp.bfloat16), w1_ref[q],
                           preferred_element_type=jnp.float32)             # (N, EMB)
    acc_ref[...] = acc_ref[...] + partial

    # Finalize on the last chunk: fc1 bias + ReLU, then fc2 (lane-dense 256-wide output).
    @pl.when(g == pl.num_programs(0) - 1)
    def _finalize():
        h = jnp.maximum(acc_ref[...] + b1_ref[...], 0.0)                   # (N, EMB) f32
        o_ref[...] = jnp.dot(h.astype(jnp.bfloat16), w2_ref[...],
                             preferred_element_type=jnp.float32) + b2_ref[...]


# ------------------------------ glue ------------------------------------------
def build_patches(x_nchw):
    """NCHW -> (NGROUPS, 4*N, G*TAPS_PAD) bf16 im2col patches.

    Row index = pool_offset*N + n; column index = pos_in_group*TAPS_PAD + tap,
    tap = (dy*3 + dx)*C_IN + ci (taps 27..31 zero-padded).
    """
    n = x_nchw.shape[0]
    x = jnp.transpose(x_nchw, (0, 2, 3, 1))                    # NHWC
    xp = jnp.pad(x, ((0, 0), (1, 1), (1, 1), (0, 0)))          # zero pad=1
    taps = [xp[:, dy:dy + H, dx:dx + W, :] for dy in range(3) for dx in range(3)]
    pt = jnp.concatenate(taps, axis=-1)                        # (N,H,W,27)
    pt = jnp.pad(pt, ((0, 0), (0, 0), (0, 0), (0, TAPS_PAD - TAPS)))   # (N,H,W,32)
    pt = pt.reshape(n, HP, 2, WP, 2, TAPS_PAD)                 # (n, pi, di, pj, dj, f)
    pt = jnp.transpose(pt, (1, 3, 2, 4, 0, 5))                 # (pi, pj, di, dj, n, f)
    pt = pt.reshape(S, 4, n, TAPS_PAD)                         # (s, k, n, f), k = di*2+dj
    pt = pt.reshape(NGROUPS, G, 4, n, TAPS_PAD)                # (grp, pos, k, n, f)
    pt = jnp.transpose(pt, (0, 2, 3, 1, 4))                    # (grp, k, n, pos, f)
    pt = pt.reshape(NGROUPS, 4 * n, G * TAPS_PAD)
    return pt.astype(jnp.bfloat16)                             # bf16 host-side (halves DMA)


def image_caption_forward(x_nchw, kparams):
    wcbd, bcbd, w1r, b1_m, w2_m, b2_m = kparams
    patches = build_patches(x_nchw)

    out = pl.pallas_call(
        fused_kernel,
        out_shape=jax.ShapeDtypeStruct((N, FC2_OUT), jnp.float32),
        grid=(NCHUNK,),
        in_specs=[
            pl.BlockSpec((GROUPS_PER_STEP, 4 * N, G * TAPS_PAD), lambda g: (g, 0, 0)),
            pl.BlockSpec((G * TAPS_PAD, G * C_OUT), lambda g: (0, 0)),
            pl.BlockSpec((1, G * C_OUT), lambda g: (0, 0)),
            pl.BlockSpec((GROUPS_PER_STEP, G * C_OUT, EMBEDDING_DIM), lambda g: (g, 0, 0)),
            pl.BlockSpec((1, EMBEDDING_DIM), lambda g: (0, 0)),
            pl.BlockSpec((EMBEDDING_DIM, FC2_OUT), lambda g: (0, 0)),
            pl.BlockSpec((1, FC2_OUT), lambda g: (0, 0)),
        ],
        out_specs=pl.BlockSpec((N, FC2_OUT), lambda g: (0, 0)),
        scratch_shapes=[
            pltpu.VMEM((N, EMBEDDING_DIM), jnp.float32),       # fc1 accumulator
        ],
        compiler_params=pltpu.CompilerParams(dimension_semantics=("arbitrary",)),
    )(patches, wcbd, bcbd, w1r, b1_m, w2_m, b2_m)
    return out


def make_params(key):
    """Deterministic synthetic parameters in PyTorch layout (f32)."""
    ks = jax.random.split(key, 6)
    wc = jax.random.normal(ks[0], (C_OUT, C_IN, 3, 3), jnp.float32) * 0.1      # conv1.weight
    bc = jax.random.normal(ks[1], (C_OUT,), jnp.float32) * 0.1                  # conv1.bias
    w1 = jax.random.normal(ks[2], (EMBEDDING_DIM, FLAT), jnp.float32) * (1.0 / jnp.sqrt(FLAT))
    b1 = jax.random.normal(ks[3], (EMBEDDING_DIM,), jnp.float32) * 0.1
    w2 = jax.random.normal(ks[4], (FC2_OUT, EMBEDDING_DIM), jnp.float32) * (1.0 / jnp.sqrt(EMBEDDING_DIM))
    b2 = jax.random.normal(ks[5], (FC2_OUT,), jnp.float32) * 0.1
    return wc, bc, w1, b1, w2, b2


def to_kernel_params(raw):
    """Permute PyTorch-layout params into the kernel's lane-dense matmul layouts (bf16)."""
    wc, bc, w1, b1, w2, b2 = raw
    # conv weight -> (TAPS_PAD, C_OUT), row index (dy*3+dx)*C_IN + ci, zero-padded to 32
    wc_m = jnp.transpose(wc, (2, 3, 1, 0)).reshape(TAPS, C_OUT)
    wc_m = jnp.pad(wc_m, ((0, TAPS_PAD - TAPS), (0, 0)))
    # block-diagonal over G positions -> conv output lanes are (position, channel) pairs
    wcbd = jnp.kron(jnp.eye(G, dtype=wc_m.dtype), wc_m).astype(jnp.bfloat16)   # (256, 512)
    bcbd = jnp.tile(bc, G).reshape(1, G * C_OUT)                               # (1, 512) f32
    # fc1 weight: PyTorch flat index = c*S + s  ->  w1r[grp, pos*C_OUT + c, e]
    w1r = jnp.transpose(w1.reshape(EMBEDDING_DIM, C_OUT, S), (2, 1, 0))        # (S, C_OUT, EMB)
    w1r = w1r.reshape(NGROUPS, G * C_OUT, EMBEDDING_DIM).astype(jnp.bfloat16)
    b1_m = b1.reshape(1, EMBEDDING_DIM)
    w2_m = w2.T.astype(jnp.bfloat16)
    b2_m = b2.reshape(1, FC2_OUT)
    return wcbd, bcbd, w1r, b1_m, w2_m, b2_m


def reference_forward(x_nchw, raw):
    """Pure-JAX f32 mirror of the PyTorch forward (NCHW), for verification."""
    wc, bc, w1, b1, w2, b2 = raw
    y = jax.lax.conv_general_dilated(
        x_nchw, wc, window_strides=(1, 1), padding=((1, 1), (1, 1)),
        dimension_numbers=("NCHW", "OIHW", "NCHW"),
        precision=jax.lax.Precision.HIGHEST)
    y = jnp.maximum(y + bc[None, :, None, None], 0.0)
    n = y.shape[0]
    y = y.reshape(n, C_OUT, HP, 2, WP, 2).max(axis=(3, 5))        # MaxPool2d(2, 2)
    flat = y.reshape(n, -1)                                        # NCHW flatten
    h = jnp.maximum(
        jnp.dot(flat, w1.T, precision=jax.lax.Precision.HIGHEST) + b1, 0.0)
    return jnp.dot(h, w2.T, precision=jax.lax.Precision.HIGHEST) + b2


if __name__ == "__main__":
    key = jax.random.PRNGKey(0)
    kx, kp = jax.random.split(key)
    x = jax.random.normal(kx, (N, C_IN, H, W), jnp.float32)   # PyTorch-style NCHW input

    raw_params = make_params(kp)
    kernel_params = to_kernel_params(raw_params)

    out = jax.jit(image_caption_forward)(x, kernel_params)
    out = jax.block_until_ready(out)
    assert out.shape == (N, FC2_OUT) and out.dtype == jnp.float32

    ref = jax.block_until_ready(reference_forward(x, raw_params))
    # Tolerance accounts for the bf16 weight/activation MXU path (f32 accumulation).
    assert jnp.allclose(out, ref, rtol=2.5e-2, atol=2.5e-2), float(jnp.max(jnp.abs(out - ref)))

    print("KERNEL_OK")
</pallas_src>

<mosaic_0001>
module attributes {stable_mosaic.version = 11 : i64} {
  func.func @fused_kernel(%arg0: i32, %arg1: memref<4x8x256xbf16, #tpu.memory_space<vmem>>, %arg2: memref<256x512xbf16, #tpu.memory_space<vmem>>, %arg3: memref<1x512xf32, #tpu.memory_space<vmem>>, %arg4: memref<4x512x256xbf16, #tpu.memory_space<vmem>>, %arg5: memref<1x256xf32, #tpu.memory_space<vmem>>, %arg6: memref<256x256xbf16, #tpu.memory_space<vmem>>, %arg7: memref<1x256xf32, #tpu.memory_space<vmem>>, %arg8: memref<2x256xf32, #tpu.memory_space<vmem>>, %arg9: memref<2x256xf32, #tpu.memory_space<vmem>>) attributes {dimension_semantics = [#tpu.dimension_semantics<arbitrary>], iteration_bounds = array<i64: 2>, scalar_prefetch = 0 : i64, scratch_operands = 1 : i64, tpu.core_type = #tpu.core_type<tc>, window_params = [{transform_indices = @transform_0, window_bounds = array<i64: 4, 8, 256>}, {pipeline_mode = #tpu.pipeline_mode<synchronous>, transform_indices = @transform_1, window_bounds = array<i64: 256, 512>}, {pipeline_mode = #tpu.pipeline_mode<synchronous>, transform_indices = @transform_2, window_bounds = array<i64: 1, 512>}, {transform_indices = @transform_3, window_bounds = array<i64: 4, 512, 256>}, {pipeline_mode = #tpu.pipeline_mode<synchronous>, transform_indices = @transform_4, window_bounds = array<i64: 1, 256>}, {pipeline_mode = #tpu.pipeline_mode<synchronous>, transform_indices = @transform_5, window_bounds = array<i64: 256, 256>}, {pipeline_mode = #tpu.pipeline_mode<synchronous>, transform_indices = @transform_6, window_bounds = array<i64: 1, 256>}, {pipeline_mode = #tpu.pipeline_mode<synchronous>, transform_indices = @transform_7, window_bounds = array<i64: 2, 256>}]} {
    %c0_i32 = arith.constant 0 : i32
    %0 = arith.cmpi eq, %arg0, %c0_i32 : i32
    %1 = arith.extui %0 : i1 to i32
    %c0_i32_0 = arith.constant 0 : i32
    %2 = arith.cmpi ne, %1, %c0_i32_0 : i32
    scf.if %2 {
      %cst_42 = arith.constant 0.000000e+00 : f32
      %88 = vector.broadcast %cst_42 : f32 to vector<2x256xf32>
      %c0_43 = arith.constant 0 : index
      %c0_44 = arith.constant 0 : index
      %89 = vector.load %arg9[%c0_43, %c0_44] : memref<2x256xf32, #tpu.memory_space<vmem>>, vector<2x256xf32>
      tpu.vector_store %arg9[%c0_43, %c0_44], %88 {strides = array<i32>} : memref<2x256xf32, #tpu.memory_space<vmem>>, vector<2x256xf32>,
    } else {
    }
    %c0 = arith.constant 0 : index
    %c0_1 = arith.constant 0 : index
    %3 = vector.load %arg2[%c0, %c0_1] : memref<256x512xbf16, #tpu.memory_space<vmem>>, vector<256x512xbf16>
    %c0_2 = arith.constant 0 : index
    %c0_3 = arith.constant 0 : index
    %4 = vector.load %arg3[%c0_2, %c0_3] : memref<1x512xf32, #tpu.memory_space<vmem>>, vector<1x512xf32>
    %cst = arith.constant 0.000000e+00 : f32
    %5 = vector.broadcast %cst : f32 to vector<2x256xf32>
    %c0_4 = arith.constant 0 : index
    %c0_5 = arith.constant 0 : index
    %c0_6 = arith.constant 0 : index
    %6 = vector.load %arg1[%c0_4, %c0_5, %c0_6] : memref<4x8x256xbf16, #tpu.memory_space<vmem>>, vector<1x8x256xbf16>
    %7 = vector.shape_cast %6 : vector<1x8x256xbf16> to vector<8x256xbf16>
    %cst_7 = arith.constant dense<0.000000e+00> : vector<8x512xf32>
    %8 = tpu.matmul %7, %3, %cst_7 {dimension_numbers = #tpu.dot_dimension_numbers<[1], [0], [0], [1], [0, 0, 1, 1], [], []>} : vector<8x256xbf16>, vector<256x512xbf16>, vector<8x512xf32> -> vector<8x512xf32>
    %9 = vector.extract_strided_slice %8 {offsets = [0, 0], sizes = [2, 512], strides = [1, 1]} : vector<8x512xf32> to vector<2x512xf32>
    %10 = vector.extract_strided_slice %8 {offsets = [2, 0], sizes = [2, 512], strides = [1, 1]} : vector<8x512xf32> to vector<2x512xf32>
    %11 = arith.maximumf %9, %10 : vector<2x512xf32>
    %12 = vector.extract_strided_slice %8 {offsets = [4, 0], sizes = [2, 512], strides = [1, 1]} : vector<8x512xf32> to vector<2x512xf32>
    %13 = vector.extract_strided_slice %8 {offsets = [6, 0], sizes = [2, 512], strides = [1, 1]} : vector<8x512xf32> to vector<2x512xf32>
    %14 = arith.maximumf %12, %13 : vector<2x512xf32>
    %15 = arith.maximumf %11, %14 : vector<2x512xf32>
    %16 = vector.broadcast %4 : vector<1x512xf32> to vector<2x512xf32>
    %17 = arith.addf %15, %16 : vector<2x512xf32>
    %cst_8 = arith.constant 0.000000e+00 : f32
    %18 = vector.broadcast %cst_8 : f32 to vector<2x512xf32>
    %19 = arith.maximumf %17, %18 : vector<2x512xf32>
    %20 = arith.truncf %19 : vector<2x512xf32> to vector<2x512xbf16>
    %c0_9 = arith.constant 0 : index
    %c0_10 = arith.constant 0 : index
    %c0_11 = arith.constant 0 : index
    %21 = vector.load %arg4[%c0_9, %c0_10, %c0_11] : memref<4x512x256xbf16, #tpu.memory_space<vmem>>, vector<1x512x256xbf16>
    %22 = vector.shape_cast %21 : vector<1x512x256xbf16> to vector<512x256xbf16>
    %cst_12 = arith.constant dense<0.000000e+00> : vector<2x256xf32>
    %23 = tpu.matmul %20, %22, %cst_12 {dimension_numbers = #tpu.dot_dimension_numbers<[1], [0], [0], [1], [0, 0, 1, 1], [], []>} : vector<2x512xbf16>, vector<512x256xbf16>, vector<2x256xf32> -> vector<2x256xf32>
    %24 = arith.addf %5, %23 : vector<2x256xf32>
    %c1 = arith.constant 1 : index
    %c0_13 = arith.constant 0 : index
    %c0_14 = arith.constant 0 : index
    %25 = vector.load %arg1[%c1, %c0_13, %c0_14] : memref<4x8x256xbf16, #tpu.memory_space<vmem>>, vector<1x8x256xbf16>
    %26 = vector.shape_cast %25 : vector<1x8x256xbf16> to vector<8x256xbf16>
    %cst_15 = arith.constant dense<0.000000e+00> : vector<8x512xf32>
    %27 = tpu.matmul %26, %3, %cst_15 {dimension_numbers = #tpu.dot_dimension_numbers<[1], [0], [0], [1], [0, 0, 1, 1], [], []>} : vector<8x256xbf16>, vector<256x512xbf16>, vector<8x512xf32> -> vector<8x512xf32>
    %28 = vector.extract_strided_slice %27 {offsets = [0, 0], sizes = [2, 512], strides = [1, 1]} : vector<8x512xf32> to vector<2x512xf32>
    %29 = vector.extract_strided_slice %27 {offsets = [2, 0], sizes = [2, 512], strides = [1, 1]} : vector<8x512xf32> to vector<2x512xf32>
    %30 = arith.maximumf %28, %29 : vector<2x512xf32>
    %31 = vector.extract_strided_slice %27 {offsets = [4, 0], sizes = [2, 512], strides = [1, 1]} : vector<8x512xf32> to vector<2x512xf32>
    %32 = vector.extract_strided_slice %27 {offsets = [6, 0], sizes = [2, 512], strides = [1, 1]} : vector<8x512xf32> to vector<2x512xf32>
    %33 = arith.maximumf %31, %32 : vector<2x512xf32>
    %34 = arith.maximumf %30, %33 : vector<2x512xf32>
    %35 = vector.broadcast %4 : vector<1x512xf32> to vector<2x512xf32>
    %36 = arith.addf %34, %35 : vector<2x512xf32>
    %cst_16 = arith.constant 0.000000e+00 : f32
    %37 = vector.broadcast %cst_16 : f32 to vector<2x512xf32>
    %38 = arith.maximumf %36, %37 : vector<2x512xf32>
    %39 = arith.truncf %38 : vector<2x512xf32> to vector<2x512xbf16>
    %c1_17 = arith.constant 1 : index
    %c0_18 = arith.constant 0 : index
    %c0_19 = arith.constant 0 : index
    %40 = vector.load %arg4[%c1_17, %c0_18, %c0_19] : memref<4x512x256xbf16, #tpu.memory_space<vmem>>, vector<1x512x256xbf16>
    %41 = vector.shape_cast %40 : vector<1x512x256xbf16> to vector<512x256xbf16>
    %cst_20 = arith.constant dense<0.000000e+00> : vector<2x256xf32>
    %42 = tpu.matmul %39, %41, %cst_20 {dimension_numbers = #tpu.dot_dimension_numbers<[1], [0], [0], [1], [0, 0, 1, 1], [], []>} : vector<2x512xbf16>, vector<512x256xbf16>, vector<2x256xf32> -> vector<2x256xf32>
    %43 = arith.addf %24, %42 : vector<2x256xf32>
    %c2 = arith.constant 2 : index
    %c0_21 = arith.constant 0 : index
    %c0_22 = arith.constant 0 : index
    %44 = vector.load %arg1[%c2, %c0_21, %c0_22] : memref<4x8x256xbf16, #tpu.memory_space<vmem>>, vector<1x8x256xbf16>
    %45 = vector.shape_cast %44 : vector<1x8x256xbf16> to vector<8x256xbf16>
    %cst_23 = arith.constant dense<0.000000e+00> : vector<8x512xf32>
    %46 = tpu.matmul %45, %3, %cst_23 {dimension_numbers = #tpu.dot_dimension_numbers<[1], [0], [0], [1], [0, 0, 1, 1], [], []>} : vector<8x256xbf16>, vector<256x512xbf16>, vector<8x512xf32> -> vector<8x512xf32>
    %47 = vector.extract_strided_slice %46 {offsets = [0, 0], sizes = [2, 512], strides = [1, 1]} : vector<8x512xf32> to vector<2x512xf32>
    %48 = vector.extract_strided_slice %46 {offsets = [2, 0], sizes = [2, 512], strides = [1, 1]} : vector<8x512xf32> to vector<2x512xf32>
    %49 = arith.maximumf %47, %48 : vector<2x512xf32>
    %50 = vector.extract_strided_slice %46 {offsets = [4, 0], sizes = [2, 512], strides = [1, 1]} : vector<8x512xf32> to vector<2x512xf32>
    %51 = vector.extract_strided_slice %46 {offsets = [6, 0], sizes = [2, 512], strides = [1, 1]} : vector<8x512xf32> to vector<2x512xf32>
    %52 = arith.maximumf %50, %51 : vector<2x512xf32>
    %53 = arith.maximumf %49, %52 : vector<2x512xf32>
    %54 = vector.broadcast %4 : vector<1x512xf32> to vector<2x512xf32>
    %55 = arith.addf %53, %54 : vector<2x512xf32>
    %cst_24 = arith.constant 0.000000e+00 : f32
    %56 = vector.broadcast %cst_24 : f32 to vector<2x512xf32>
    %57 = arith.maximumf %55, %56 : vector<2x512xf32>
    %58 = arith.truncf %57 : vector<2x512xf32> to vector<2x512xbf16>
    %c2_25 = arith.constant 2 : index
    %c0_26 = arith.constant 0 : index
    %c0_27 = arith.constant 0 : index
    %59 = vector.load %arg4[%c2_25, %c0_26, %c0_27] : memref<4x512x256xbf16, #tpu.memory_space<vmem>>, vector<1x512x256xbf16>
    %60 = vector.shape_cast %59 : vector<1x512x256xbf16> to vector<512x256xbf16>
    %cst_28 = arith.constant dense<0.000000e+00> : vector<2x256xf32>
    %61 = tpu.matmul %58, %60, %cst_28 {dimension_numbers = #tpu.dot_dimension_numbers<[1], [0], [0], [1], [0, 0, 1, 1], [], []>} : vector<2x512xbf16>, vector<512x256xbf16>, vector<2x256xf32> -> vector<2x256xf32>
    %62 = arith.addf %43, %61 : vector<2x256xf32>
    %c3 = arith.constant 3 : index
    %c0_29 = arith.constant 0 : index
    %c0_30 = arith.constant 0 : index
    %63 = vector.load %arg1[%c3, %c0_29, %c0_30] : memref<4x8x256xbf16, #tpu.memory_space<vmem>>, vector<1x8x256xbf16>
    %64 = vector.shape_cast %63 : vector<1x8x256xbf16> to vector<8x256xbf16>
    %cst_31 = arith.constant dense<0.000000e+00> : vector<8x512xf32>
    %65 = tpu.matmul %64, %3, %cst_31 {dimension_numbers = #tpu.dot_dimension_numbers<[1], [0], [0], [1], [0, 0, 1, 1], [], []>} : vector<8x256xbf16>, vector<256x512xbf16>, vector<8x512xf32> -> vector<8x512xf32>
    %66 = vector.extract_strided_slice %65 {offsets = [0, 0], sizes = [2, 512], strides = [1, 1]} : vector<8x512xf32> to vector<2x512xf32>
    %67 = vector.extract_strided_slice %65 {offsets = [2, 0], sizes = [2, 512], strides = [1, 1]} : vector<8x512xf32> to vector<2x512xf32>
    %68 = arith.maximumf %66, %67 : vector<2x512xf32>
    %69 = vector.extract_strided_slice %65 {offsets = [4, 0], sizes = [2, 512], strides = [1, 1]} : vector<8x512xf32> to vector<2x512xf32>
    %70 = vector.extract_strided_slice %65 {offsets = [6, 0], sizes = [2, 512], strides = [1, 1]} : vector<8x512xf32> to vector<2x512xf32>
    %71 = arith.maximumf %69, %70 : vector<2x512xf32>
    %72 = arith.maximumf %68, %71 : vector<2x512xf32>
    %73 = vector.broadcast %4 : vector<1x512xf32> to vector<2x512xf32>
    %74 = arith.addf %72, %73 : vector<2x512xf32>
    %cst_32 = arith.constant 0.000000e+00 : f32
    %75 = vector.broadcast %cst_32 : f32 to vector<2x512xf32>
    %76 = arith.maximumf %74, %75 : vector<2x512xf32>
    %77 = arith.truncf %76 : vector<2x512xf32> to vector<2x512xbf16>
    %c3_33 = arith.constant 3 : index
    %c0_34 = arith.constant 0 : index
    %c0_35 = arith.constant 0 : index
    %78 = vector.load %arg4[%c3_33, %c0_34, %c0_35] : memref<4x512x256xbf16, #tpu.memory_space<vmem>>, vector<1x512x256xbf16>
    %79 = vector.shape_cast %78 : vector<1x512x256xbf16> to vector<512x256xbf16>
    %cst_36 = arith.constant dense<0.000000e+00> : vector<2x256xf32>
    %80 = tpu.matmul %77, %79, %cst_36 {dimension_numbers = #tpu.dot_dimension_numbers<[1], [0], [0], [1], [0, 0, 1, 1], [], []>} : vector<2x512xbf16>, vector<512x256xbf16>, vector<2x256xf32> -> vector<2x256xf32>
    %81 = arith.addf %62, %80 : vector<2x256xf32>
    %c0_37 = arith.constant 0 : index
    %c0_38 = arith.constant 0 : index
    %82 = vector.load %arg9[%c0_37, %c0_38] : memref<2x256xf32, #tpu.memory_space<vmem>>, vector<2x256xf32>
    %83 = arith.addf %82, %81 : vector<2x256xf32>
    %c0_39 = arith.constant 0 : index
    %c0_40 = arith.constant 0 : index
    %84 = vector.load %arg9[%c0_39, %c0_40] : memref<2x256xf32, #tpu.memory_space<vmem>>, vector<2x256xf32>
    tpu.vector_store %arg9[%c0_39, %c0_40], %83 {strides = array<i32>} : memref<2x256xf32, #tpu.memory_space<vmem>>, vector<2x256xf32>,
    %c1_i32 = arith.constant 1 : i32
    %85 = arith.cmpi eq, %arg0, %c1_i32 : i32
    %86 = arith.extui %85 : i1 to i32
    %c0_i32_41 = arith.constant 0 : i32
    %87 = arith.cmpi ne, %86, %c0_i32_41 : i32
    scf.if %87 {
      %c0_42 = arith.constant 0 : index
      %c0_43 = arith.constant 0 : index
      %88 = vector.load %arg9[%c0_42, %c0_43] : memref<2x256xf32, #tpu.memory_space<vmem>>, vector<2x256xf32>
      %c0_44 = arith.constant 0 : index
      %c0_45 = arith.constant 0 : index
      %89 = vector.load %arg5[%c0_44, %c0_45] : memref<1x256xf32, #tpu.memory_space<vmem>>, vector<1x256xf32>
      %90 = vector.broadcast %89 : vector<1x256xf32> to vector<2x256xf32>
      %91 = arith.addf %88, %90 : vector<2x256xf32>
      %cst_46 = arith.constant 0.000000e+00 : f32
      %92 = vector.broadcast %cst_46 : f32 to vector<2x256xf32>
      %93 = arith.maximumf %91, %92 : vector<2x256xf32>
      %94 = arith.truncf %93 : vector<2x256xf32> to vector<2x256xbf16>
      %c0_47 = arith.constant 0 : index
      %c0_48 = arith.constant 0 : index
      %95 = vector.load %arg6[%c0_47, %c0_48] : memref<256x256xbf16, #tpu.memory_space<vmem>>, vector<256x256xbf16>
      %cst_49 = arith.constant dense<0.000000e+00> : vector<2x256xf32>
      %96 = tpu.matmul %94, %95, %cst_49 {dimension_numbers = #tpu.dot_dimension_numbers<[1], [0], [0], [1], [0, 0, 1, 1], [], []>} : vector<2x256xbf16>, vector<256x256xbf16>, vector<2x256xf32> -> vector<2x256xf32>
      %c0_50 = arith.constant 0 : index
      %c0_51 = arith.constant 0 : index
      %97 = vector.load %arg7[%c0_50, %c0_51] : memref<1x256xf32, #tpu.memory_space<vmem>>, vector<1x256xf32>
      %98 = vector.broadcast %97 : vector<1x256xf32> to vector<2x256xf32>
      %99 = arith.addf %96, %98 : vector<2x256xf32>
      %c0_52 = arith.constant 0 : index
      %c0_53 = arith.constant 0 : index
      %100 = vector.load %arg8[%c0_52, %c0_53] : memref<2x256xf32, #tpu.memory_space<vmem>>, vector<2x256xf32>
      tpu.vector_store %arg8[%c0_52, %c0_53], %99 {strides = array<i32>} : memref<2x256xf32, #tpu.memory_space<vmem>>, vector<2x256xf32>,
    } else {
    }
    return
  }
  func.func @transform_0(%arg0: i32) -> (i32, i32, i32) {
    %c0_i32 = arith.constant 0 : i32
    %c0_i32_0 = arith.constant 0 : i32
    %c0_i32_1 = arith.constant 0 : i32
    return %arg0, %c0_i32, %c0_i32_0 : i32, i32, i32
  }
  func.func @transform_1(%arg0: i32) -> (i32, i32) {
    %c0_i32 = arith.constant 0 : i32
    %c0_i32_0 = arith.constant 0 : i32
    %c0_i32_1 = arith.constant 0 : i32
    return %c0_i32, %c0_i32_0 : i32, i32
  }
  func.func @transform_2(%arg0: i32) -> (i32, i32) {
    %c0_i32 = arith.constant 0 : i32
    %c0_i32_0 = arith.constant 0 : i32
    %c0_i32_1 = arith.constant 0 : i32
    return %c0_i32, %c0_i32_0 : i32, i32
  }
  func.func @transform_3(%arg0: i32) -> (i32, i32, i32) {
    %c0_i32 = arith.constant 0 : i32
    %c0_i32_0 = arith.constant 0 : i32
    %c0_i32_1 = arith.constant 0 : i32
    return %arg0, %c0_i32, %c0_i32_0 : i32, i32, i32
  }
  func.func @transform_4(%arg0: i32) -> (i32, i32) {
    %c0_i32 = arith.constant 0 : i32
    %c0_i32_0 = arith.constant 0 : i32
    %c0_i32_1 = arith.constant 0 : i32
    return %c0_i32, %c0_i32_0 : i32, i32
  }
  func.func @transform_5(%arg0: i32) -> (i32, i32) {
    %c0_i32 = arith.constant 0 : i32
    %c0_i32_0 = arith.constant 0 : i32
    %c0_i32_1 = arith.constant 0 : i32
    return %c0_i32, %c0_i32_0 : i32, i32
  }
  func.func @transform_6(%arg0: i32) -> (i32, i32) {
    %c0_i32 = arith.constant 0 : i32
    %c0_i32_0 = arith.constant 0 : i32
    %c0_i32_1 = arith.constant 0 : i32
    return %c0_i32, %c0_i32_0 : i32, i32
  }
  func.func @transform_7(%arg0: i32) -> (i32, i32) {
    %c0_i32 = arith.constant 0 : i32
    %c0_i32_0 = arith.constant 0 : i32
    %c0_i32_1 = arith.constant 0 : i32
    return %c0_i32, %c0_i32_0 : i32, i32
  }
}

</mosaic_0001>

<bundles_post_ra>
// kernel: image_caption_forward.1
= control target key start
LH: loop header
LB: loop body
LE: loop exit
PB: predicated region body
PF: predicated region fallthrough
CT: control target
= control target key end

     0   :  { %12 = vsyncpa [#allocation4], 0  ;;  %s4754_s24 = smov 0   ;;  %s6126_s0 = inlined_call_operand.vmem [shape: bf16[8,8,256], index: 0, kind: input, shape index: {}]   ;;  %s6127_s1 = inlined_call_operand.vmem [shape: bf16[256,512], index: 1, kind: input, shape index: {}]   ;;  %s6128_s2 = inlined_call_operand.vmem [shape: f32[1,512], index: 2, kind: input, shape index: {}]   ;;  %s6129_s3 = inlined_call_operand.vmem [shape: bf16[8,512,256], index: 3, kind: input, shape index: {}]   ;;  %s6130_s4 = inlined_call_operand.vmem [shape: f32[1,256], index: 4, kind: input, shape index: {}]   ;;  %s6131_s5 = inlined_call_operand.vmem [shape: bf16[256,256], index: 5, kind: input, shape index: {}]   ;;  %s6132_s6 = inlined_call_operand.vmem [shape: f32[1,256], index: 6, kind: input, shape index: {}]   ;;  %s6133_s7 = inlined_call_operand.hbm [shape: f32[2,256], index: 7, kind: output, shape index: {}]  }
   0x1 LB: > { %s4760_s25 = sadd.s32 4294967295, %s4709_s24   ;;  %p3487_p0 = scmp.ge.s32.totalorder %s4709_s24, 1  ;;  %s4709_s24 = sphi %s4754_s24, %s18_s24  }
   0x2   : > { %p247_p1 = scmp.lt.s32.totalorder %s4709_s24, 3 }
   0x4   : > { %p248_p2 = pnand %p3487_p0, %p247_p1 }
   0x6   : > { %251 = sbr.rel (%p248_p2) target bundleno = 1457 (0x5b1), region = 48 }
   0xb   : > { %s3488_s26 = sshll.u32 %s4760_s25, 2  ;;  %p3494_p4 = scmp.ne.s32.totalorder %s4760_s25, 0 }
   0xc   : > { %p282_p3 = scmp.lt.s32.totalorder %s3488_s26, 7 }
   0xd   : > { %298 = sbr.rel (%p3494_p4) target bundleno = 20 (0x14), region = 52 }
   0xe   : > { %s6237_s26 = smov (!%p282_p3, %s3488_s26), 7 }
   0xf   : > { %s4056_s27 = sshll.u32 %s6237_s26, 3  ;;  %s4057_s28 = sshll.u32 %s6237_s26, 9 }
  0x10   : > { %s4768_s8 = scalar_lea.vmem %s6126_s0, %s4056_s27  ;;  %s4773_s11 = scalar_lea.vmem %s6129_s3, %s4057_s28 }
  0x12   : > { %v4711_v0 = vmov 0.0  }
  0x13   : > { %299 = vst [vmem:[#allocation2] sm:$0xf] %v4711_v0 }
  0x14 PF: > { %v4779_v1 = vld [vmem:[%s6127_s1 + $0xe4] ss:$16 sps:$4 sm:$0xff]   ;;  %v4784_v2 = vld [vmem:[%s6127_s1 + $0xec] ss:$16 sps:$4 sm:$0xff]   ;;  %v4790_v3 = vld [vmem:[%s6127_s1 + $0xe0] ss:$16 sps:$4 sm:$0xff]  }
  0x15   : > { %693 = vmatprep.subr.bf16.mxu0 %v4779_v1  ;;  %v4795_v4 = vld [vmem:[%s6127_s1 + $0xe8] ss:$16 sps:$4 sm:$0xff]   ;;  %734 = vmatprep.subr.bf16.mxu1 %v4784_v2  ;;  %v4801_v5 = vld [vmem:[%s6127_s1 + $0xc4] ss:$16 sps:$4 sm:$0xff]   ;;  %v4808_v6 = vld [vmem:[%s6127_s1 + $0xcc] ss:$16 sps:$4 sm:$0xff]  }
  0x16   : > { %694 = vmatpush1.bf16.msra.mxu0 %v4790_v3  ;;  %735 = vmatpush1.bf16.msra.mxu1 %v4795_v4  ;;  %v4813_v7 = vld [vmem:[%s6127_s1 + $0xc0] ss:$16 sps:$4 sm:$0xff]   ;;  %v4819_v8 = vld [vmem:[%s6127_s1 + $0xc8] ss:$16 sps:$4 sm:$0xff]   ;;  %v4825_v9 = vld [vmem:[%s6127_s1 + $0xa4] ss:$16 sps:$4 sm:$0xff]  }
  0x17   : > { %695 = vmatprep.subr.bf16.mxu0 %v4801_v5  ;;  %736 = vmatprep.subr.bf16.mxu1 %v4808_v6  ;;  %v4830_v10 = vld [vmem:[%s6127_s1 + $0xac] ss:$16 sps:$4 sm:$0xff]   ;;  %v4835_v11 = vld [vmem:[%s6127_s1 + $0xa0] ss:$16 sps:$4 sm:$0xff]   ;;  %v4840_v12 = vld [vmem:[%s6127_s1 + $0xa8] ss:$16 sps:$4 sm:$0xff]  }
  0x18   : > { %v4847_v13 = vld [vmem:[%s6127_s1 + $0x84] ss:$16 sps:$4 sm:$0xff]   ;;  %v4854_v14 = vld [vmem:[%s6127_s1 + $0x8c] ss:$16 sps:$4 sm:$0xff]   ;;  %v4859_v15 = vld [vmem:[%s6127_s1 + $0x80] ss:$16 sps:$4 sm:$0xff]  }
  0x19   : > { %v4866_v16 = vld [vmem:[%s6127_s1 + $0x88] ss:$16 sps:$4 sm:$0xff]   ;;  %v4871_v17 = vld [vmem:[%s6127_s1 + $0x64] ss:$16 sps:$4 sm:$0xff]   ;;  %v4878_v18 = vld [vmem:[%s6127_s1 + $0x6c] ss:$16 sps:$4 sm:$0xff]  }
  0x1a   : > { %696 = vmatpush1.bf16.msra.mxu0 %v4813_v7  ;;  %737 = vmatpush1.bf16.msra.mxu1 %v4819_v8  ;;  %v4883_v19 = vld [vmem:[%s6127_s1 + $0x60] ss:$16 sps:$4 sm:$0xff]   ;;  %v4888_v20 = vld [vmem:[%s6127_s1 + $0x68] ss:$16 sps:$4 sm:$0xff]   ;;  %v4895_v21 = vld [vmem:[%s6127_s1 + $0x44] ss:$16 sps:$4 sm:$0xff]  }
  0x1b   : > { %697 = vmatprep.subr.bf16.mxu0 %v4825_v9  ;;  %738 = vmatprep.subr.bf16.mxu1 %v4830_v10  ;;  %v4902_v22 = vld [vmem:[%s6127_s1 + $0x4c] ss:$16 sps:$4 sm:$0xff]   ;;  %v4907_v23 = vld [vmem:[%s6127_s1 + $0x40] ss:$16 sps:$4 sm:$0xff]   ;;  %v4914_v24 = vld [vmem:[%s6127_s1 + $0x48] ss:$16 sps:$4 sm:$0xff]  }
  0x1c   : > { %v4919_v25 = vld [vmem:[%s6127_s1 + $0x24] ss:$16 sps:$4 sm:$0xff]   ;;  %v4926_v26 = vld [vmem:[%s6127_s1 + $0x2c] ss:$16 sps:$4 sm:$0xff]   ;;  %v4931_v27 = vld [vmem:[%s6127_s1 + $0x20] ss:$16 sps:$4 sm:$0xff]  }
  0x1d   : > { %v4936_v28 = vld [vmem:[%s6127_s1 + $0x28] ss:$16 sps:$4 sm:$0xff]   ;;  %v4943_v29 = vld [vmem:[%s6127_s1 + $0x4] ss:$16 sps:$4 sm:$0xff]   ;;  %v4950_v30 = vld [vmem:[%s6127_s1 + $0xc] ss:$16 sps:$4 sm:$0xff]  }
  0x1e   : > { %698 = vmatpush1.bf16.msra.mxu0 %v4835_v11  ;;  %739 = vmatpush1.bf16.msra.mxu1 %v4840_v12  ;;  %v4955_v31 = vld [vmem:[%s6127_s1] ss:$16 sps:$4 sm:$0xff]   ;;  %v4962_v32 = vld [vmem:[%s6127_s1 + $0x8] ss:$16 sps:$4 sm:$0xff]   ;;  %v4967_v33 = vld [vmem:[%s6127_s1 + $0x1e4] ss:$16 sps:$4 sm:$0xff]  }
  0x1f   : > { %699 = vmatprep.subr.bf16.mxu0 %v4847_v13  ;;  %740 = vmatprep.subr.bf16.mxu1 %v4854_v14  ;;  %v4974_v34 = vld [vmem:[%s6127_s1 + $0x1ec] ss:$16 sps:$4 sm:$0xff]   ;;  %v4979_v35 = vld [vmem:[%s6127_s1 + $0x1e0] ss:$16 sps:$4 sm:$0xff]   ;;  %v4984_v36 = vld [vmem:[%s6127_s1 + $0x1e8] ss:$16 sps:$4 sm:$0xff]  }
  0x20   : > { %v4991_v37 = vld [vmem:[%s6127_s1 + $0x1c4] ss:$16 sps:$4 sm:$0xff]   ;;  %v4998_v38 = vld [vmem:[%s6127_s1 + $0x1cc] ss:$16 sps:$4 sm:$0xff]   ;;  %v5003_v39 = vld [vmem:[%s6127_s1 + $0x1c0] ss:$16 sps:$4 sm:$0xff]  }
  0x21   : > { %v5010_v40 = vld [vmem:[%s6127_s1 + $0x1c8] ss:$16 sps:$4 sm:$0xff]   ;;  %v5015_v41 = vld [vmem:[%s6127_s1 + $0x1a4] ss:$16 sps:$4 sm:$0xff]   ;;  %v5022_v42 = vld [vmem:[%s6127_s1 + $0x1ac] ss:$16 sps:$4 sm:$0xff]  }
  0x22   : > { %700 = vmatpush1.bf16.msra.mxu0 %v4859_v15  ;;  %741 = vmatpush1.bf16.msra.mxu1 %v4866_v16  ;;  %v5027_v43 = vld [vmem:[%s6127_s1 + $0x1a0] ss:$16 sps:$4 sm:$0xff]   ;;  %v5032_v44 = vld [vmem:[%s6127_s1 + $0x1a8] ss:$16 sps:$4 sm:$0xff]   ;;  %v5039_v45 = vld [vmem:[%s6127_s1 + $0x184] ss:$16 sps:$4 sm:$0xff]  }
  0x23   : > { %701 = vmatprep.subr.bf16.mxu0 %v4871_v17  ;;  %742 = vmatprep.subr.bf16.mxu1 %v4878_v18  ;;  %v5046_v46 = vld [vmem:[%s6127_s1 + $0x18c] ss:$16 sps:$4 sm:$0xff]   ;;  %v5051_v47 = vld [vmem:[%s6127_s1 + $0x180] ss:$16 sps:$4 sm:$0xff]   ;;  %v5056_v48 = vld [vmem:[%s6127_s1 + $0x188] ss:$16 sps:$4 sm:$0xff]  }
  0x24   : > { %v365_v49 = vld [vmem:[%s4768_s8] sm:$0xff]  ;;  %v5067_v51 = vld [vmem:[%s6127_s1 + $0x16c] ss:$16 sps:$4 sm:$0xff]   ;;  %v5081_v54 = vld [vmem:[%s6127_s1 + $0x168] ss:$16 sps:$4 sm:$0xff]   ;;  %p4018_p5 = scmp.ne.s32.totalorder %s4760_s25, 1 }
  0x25   : > { %v5062_v50 = vld [vmem:[%s6127_s1 + $0x164] ss:$16 sps:$4 sm:$0xff]   ;;  %v3496_v52 = vcombine.high %v365_v49, %v365_v49  ;;  %v5076_v53 = vld [vmem:[%s6127_s1 + $0x160] ss:$16 sps:$4 sm:$0xff]   ;;  %v5091_v56 = vld [vmem:[%s6127_s1 + $0x14c] ss:$16 sps:$4 sm:$0xff]  }
  0x26   : > { %702 = vmatpush1.bf16.msra.mxu0 %v4883_v19  ;;  %743 = vmatpush1.bf16.msra.mxu1 %v4888_v20  ;;  %v5086_v55 = vld [vmem:[%s6127_s1 + $0x144] ss:$16 sps:$4 sm:$0xff]   ;;  %6168 = vst [vmem:[#allocation6_spill] sm:$0xff] %v5091_v56  ;;  %v5100_v57 = vld [vmem:[%s6127_s1 + $0x140] ss:$16 sps:$4 sm:$0xff]  }
  0x27   : > { %703 = vmatprep.subr.bf16.mxu0 %v4895_v21  ;;  %744 = vmatprep.subr.bf16.mxu1 %v4902_v22  ;;  %v5105_v58 = vld [vmem:[%s6127_s1 + $0x148] ss:$16 sps:$4 sm:$0xff]   ;;  %v5110_v59 = vld [vmem:[%s6127_s1 + $0x124] ss:$16 sps:$4 sm:$0xff]   ;;  %v5115_v60 = vld [vmem:[%s6127_s1 + $0x12c] ss:$16 sps:$4 sm:$0xff]  }
  0x28   : > { %725 = vmatprep.mubr.bf16.mxu0 %v3496_v52  ;;  %766 = vmatprep.mubr.bf16.mxu1 %v3496_v52  ;;  %6169 = vst [vmem:[#allocation7_spill] sm:$0xff] %v5110_v59  ;;  %6170 = vst [vmem:[#allocation8_spill] sm:$0xff] %v5115_v60  ;;  %v5124_v61 = vld [vmem:[%s6127_s1 + $0x120] ss:$16 sps:$4 sm:$0xff]   ;;  %v5129_v62 = vld [vmem:[%s6127_s1 + $0x128] ss:$16 sps:$4 sm:$0xff]  }
  0x29   : > { %6171 = vst [vmem:[#allocation9_spill] sm:$0xff] %v5124_v61  ;;  %v5134_v63 = vld [vmem:[%s6127_s1 + $0x104] ss:$16 sps:$4 sm:$0xff]   ;;  %v5139_v0 = vld [vmem:[%s6127_s1 + $0x10c] ss:$16 sps:$4 sm:$0xff]  }
  0x2a   : > { %704 = vmatpush1.bf16.msra.mxu0 %v4907_v23  ;;  %745 = vmatpush1.bf16.msra.mxu1 %v4914_v24  ;;  %v5148_v52 = vld [vmem:[%s6127_s1 + $0x100] ss:$16 sps:$4 sm:$0xff]  }
  0x2b   : > { %705 = vmatprep.subr.bf16.mxu0 %v4919_v25  ;;  %746 = vmatprep.subr.bf16.mxu1 %v4926_v26 }
  0x2e   : > { %706 = vmatpush1.bf16.msra.mxu0 %v4931_v27  ;;  %747 = vmatpush1.bf16.msra.mxu1 %v4936_v28 }
  0x2f   : > { %707 = vmatprep.subr.bf16.mxu0 %v4943_v29  ;;  %748 = vmatprep.subr.bf16.mxu1 %v4950_v30 }
  0x32   : > { %708 = vmatpush1.bf16.msra.mxu0 %v4955_v31  ;;  %749 = vmatpush1.bf16.msra.mxu1 %v4962_v32 }
  0x33   : > { %709 = vmatprep.subr.bf16.mxu0 %v4967_v33  ;;  %750 = vmatprep.subr.bf16.mxu1 %v4974_v34 }
  0x36   : > { %710 = vmatpush2.bf16.msra.mxu0 %v4979_v35  ;;  %751 = vmatpush2.bf16.msra.mxu1 %v4984_v36 }
  0x37   : > { %711 = vmatprep.subr.bf16.mxu0 %v4991_v37  ;;  %752 = vmatprep.subr.bf16.mxu1 %v4998_v38 }
  0x3a   : > { %712 = vmatpush2.bf16.msra.mxu0 %v5003_v39  ;;  %753 = vmatpush2.bf16.msra.mxu1 %v5010_v40 }
  0x3b   : > { %713 = vmatprep.subr.bf16.mxu0 %v5015_v41  ;;  %754 = vmatprep.subr.bf16.mxu1 %v5022_v42 }
  0x3e   : > { %714 = vmatpush2.bf16.msra.mxu0 %v5027_v43  ;;  %755 = vmatpush2.bf16.msra.mxu1 %v5032_v44 }
  0x3f   : > { %715 = vmatprep.subr.bf16.mxu0 %v5039_v45  ;;  %756 = vmatprep.subr.bf16.mxu1 %v5046_v46 }
  0x42   : > { %716 = vmatpush2.bf16.msra.mxu0 %v5051_v47  ;;  %757 = vmatpush2.bf16.msra.mxu1 %v5056_v48 }
  0x43   : > { %717 = vmatprep.subr.bf16.mxu0 %v5062_v50  ;;  %758 = vmatprep.subr.bf16.mxu1 %v5067_v51 }
  0x46   : > { %718 = vmatpush2.bf16.msra.mxu0 %v5076_v53  ;;  %759 = vmatpush2.bf16.msra.mxu1 %v5081_v54 }
  0x47   : > { %719 = vmatprep.subr.bf16.mxu0 %v5086_v55  ;;  %760 = vmatprep.subr.bf16.mxu1 %v5091_v56  ;;  %v5153_v56 = vld [vmem:[%s6127_s1 + $0x108] ss:$16 sps:$4 sm:$0xff]  }
  0x4a   : > { %720 = vmatpush2.bf16.msra.mxu0 %v5100_v57  ;;  %761 = vmatpush2.bf16.msra.mxu1 %v5105_v58 }
  0x4b   : > { %721 = vmatprep.subr.bf16.mxu0 %v5110_v59  ;;  %762 = vmatprep.subr.bf16.mxu1 %v5115_v60  ;;  %v5160_v59 = vld [vmem:[%s4768_s8 + $0x8] sm:$0xff]  ;;  %v3495_v60 = vcombine.low %v365_v49, %v365_v49  ;;  %v4238_v49 = vld [vmem:[%s4773_s11 + $0x3d0] ss:$8 sps:$4 sm:$0xff]  }
  0x4e   : > { %722 = vmatpush2.bf16.msra.mxu0 %v5124_v61  ;;  %763 = vmatpush2.bf16.msra.mxu1 %v5129_v62  ;;  %v3563_v61 = vcombine.high %v5160_v59, %v5160_v59 }
  0x4f   : > { %723 = vmatprep.subr.bf16.mxu0 %v5134_v63  ;;  %764 = vmatprep.subr.bf16.mxu1 %v5139_v0 }
  0x52   : > { %724 = vmatpush2.bf16.msra.mxu0 %v5148_v52  ;;  %765 = vmatpush2.bf16.msra.mxu1 %v5153_v56 }
  0x53   : > { %913 = vmatprep.subr.bf16.mxu0 %v4779_v1  ;;  %954 = vmatprep.subr.bf16.mxu1 %v4784_v2  ;;  %v6172_v1 = vld [vmem:[#allocation6_spill] sm:$0xff]  ;;  %v6173_v2 = vld [vmem:[#allocation7_spill] sm:$0xff] }
  0x55   : > { %726 = vmatmul.mubr.bf16.vlgmr.msra.gmra.mxu0 %v3495_v60  ;;  %767 = vmatmul.mubr.bf16.vlgmr.msra.gmra.mxu1 %v3495_v60  ;;  %v4258_v60 = vld [vmem:[%s4773_s11 + $0x3a4] ss:$8 sps:$4 sm:$0xff]  }
  0x56   : > { %914 = vmatpush1.bf16.msra.mxu0 %v4790_v3  ;;  %955 = vmatpush1.bf16.msra.mxu1 %v4795_v4  ;;  %v6174_v3 = vld [vmem:[#allocation8_spill] sm:$0xff]  ;;  %v6175_v4 = vld [vmem:[#allocation9_spill] sm:$0xff] }
  0x57   : > { %915 = vmatprep.subr.bf16.mxu0 %v4801_v5  ;;  %956 = vmatprep.subr.bf16.mxu1 %v4808_v6  ;;  %v3562_v5 = vcombine.low %v5160_v59, %v5160_v59  ;;  %v4175_v6 = vld [vmem:[%s4773_s11 + $0x270] ss:$8 sps:$4 sm:$0xff]   ;;  %v4255_v59 = vld [vmem:[%s4773_s11 + $0x2a4] ss:$8 sps:$4 sm:$0xff]  }
  0x58   : > { %945 = vmatprep.mubr.bf16.mxu0 %v3563_v61  ;;  %986 = vmatprep.mubr.bf16.mxu1 %v3563_v61  ;;  %v4253_v61 = vld [vmem:[%s4773_s11 + $0x2a0] ss:$8 sps:$4 sm:$0xff]  }
  0x5a   : > { %916 = vmatpush1.bf16.msra.mxu0 %v4813_v7  ;;  %957 = vmatpush1.bf16.msra.mxu1 %v4819_v8  ;;  %v4177_v7 = vld [vmem:[%s4773_s11 + $0x274] ss:$8 sps:$4 sm:$0xff]   ;;  %v4178_v8 = vld [vmem:[%s4773_s11 + $0x370] ss:$8 sps:$4 sm:$0xff]  }
  0x5b   : > { %917 = vmatprep.subr.bf16.mxu0 %v4825_v9  ;;  %958 = vmatprep.subr.bf16.mxu1 %v4830_v10  ;;  %v4180_v9 = vld [vmem:[%s4773_s11 + $0x374] ss:$8 sps:$4 sm:$0xff]   ;;  %v4183_v10 = vld [vmem:[%s4773_s11 + $0x264] ss:$8 sps:$4 sm:$0xff]  }
  0x5e   : > { %918 = vmatpush1.bf16.msra.mxu0 %v4835_v11  ;;  %959 = vmatpush1.bf16.msra.mxu1 %v4840_v12  ;;  %v4186_v11 = vld [vmem:[%s4773_s11 + $0x364] ss:$8 sps:$4 sm:$0xff]   ;;  %v4181_v12 = vld [vmem:[%s4773_s11 + $0x260] ss:$8 sps:$4 sm:$0xff]  }
  0x5f   : > { %919 = vmatprep.subr.bf16.mxu0 %v4847_v13  ;;  %960 = vmatprep.subr.bf16.mxu1 %v4854_v14  ;;  %v4184_v13 = vld [vmem:[%s4773_s11 + $0x360] ss:$8 sps:$4 sm:$0xff]   ;;  %v4189_v14 = vld [vmem:[%s4773_s11 + $0x254] ss:$8 sps:$4 sm:$0xff]  }
  0x62   : > { %920 = vmatpush1.bf16.msra.mxu0 %v4859_v15  ;;  %961 = vmatpush1.bf16.msra.mxu1 %v4866_v16  ;;  %v4192_v15 = vld [vmem:[%s4773_s11 + $0x354] ss:$8 sps:$4 sm:$0xff]   ;;  %v4187_v16 = vld [vmem:[%s4773_s11 + $0x250] ss:$8 sps:$4 sm:$0xff]  }
  0x63   : > { %921 = vmatprep.subr.bf16.mxu0 %v4871_v17  ;;  %962 = vmatprep.subr.bf16.mxu1 %v4878_v18  ;;  %v4190_v17 = vld [vmem:[%s4773_s11 + $0x350] ss:$8 sps:$4 sm:$0xff]   ;;  %v4195_v18 = vld [vmem:[%s4773_s11 + $0x244] ss:$8 sps:$4 sm:$0xff]  }
  0x66   : > { %922 = vmatpush1.bf16.msra.mxu0 %v4883_v19  ;;  %963 = vmatpush1.bf16.msra.mxu1 %v4888_v20  ;;  %v4198_v19 = vld [vmem:[%s4773_s11 + $0x344] ss:$8 sps:$4 sm:$0xff]   ;;  %v4193_v20 = vld [vmem:[%s4773_s11 + $0x240] ss:$8 sps:$4 sm:$0xff]  }
  0x67   : > { %923 = vmatprep.subr.bf16.mxu0 %v4895_v21  ;;  %964 = vmatprep.subr.bf16.mxu1 %v4902_v22  ;;  %v4196_v21 = vld [vmem:[%s4773_s11 + $0x340] ss:$8 sps:$4 sm:$0xff]   ;;  %v4201_v22 = vld [vmem:[%s4773_s11 + $0x234] ss:$8 sps:$4 sm:$0xff]  }
  0x6a   : > { %924 = vmatpush1.bf16.msra.mxu0 %v4907_v23  ;;  %965 = vmatpush1.bf16.msra.mxu1 %v4914_v24  ;;  %v4204_v23 = vld [vmem:[%s4773_s11 + $0x334] ss:$8 sps:$4 sm:$0xff]   ;;  %v4199_v24 = vld [vmem:[%s4773_s11 + $0x230] ss:$8 sps:$4 sm:$0xff]  }
  0x6b   : > { %925 = vmatprep.subr.bf16.mxu0 %v4919_v25  ;;  %966 = vmatprep.subr.bf16.mxu1 %v4926_v26  ;;  %v4202_v25 = vld [vmem:[%s4773_s11 + $0x330] ss:$8 sps:$4 sm:$0xff]   ;;  %v4207_v26 = vld [vmem:[%s4773_s11 + $0x224] ss:$8 sps:$4 sm:$0xff]  }
  0x6e   : > { %926 = vmatpush1.bf16.msra.mxu0 %v4931_v27  ;;  %967 = vmatpush1.bf16.msra.mxu1 %v4936_v28  ;;  %v4210_v27 = vld [vmem:[%s4773_s11 + $0x324] ss:$8 sps:$4 sm:$0xff]   ;;  %v4205_v28 = vld [vmem:[%s4773_s11 + $0x220] ss:$8 sps:$4 sm:$0xff]  }
  0x6f   : > { %927 = vmatprep.subr.bf16.mxu0 %v4943_v29  ;;  %968 = vmatprep.subr.bf16.mxu1 %v4950_v30  ;;  %v4208_v29 = vld [vmem:[%s4773_s11 + $0x320] ss:$8 sps:$4 sm:$0xff]   ;;  %v4213_v30 = vld [vmem:[%s4773_s11 + $0x214] ss:$8 sps:$4 sm:$0xff]  }
  0x72   : > { %928 = vmatpush1.bf16.msra.mxu0 %v4955_v31  ;;  %969 = vmatpush1.bf16.msra.mxu1 %v4962_v32  ;;  %v4216_v31 = vld [vmem:[%s4773_s11 + $0x314] ss:$8 sps:$4 sm:$0xff]   ;;  %v4211_v32 = vld [vmem:[%s4773_s11 + $0x210] ss:$8 sps:$4 sm:$0xff]  }
  0x73   : > { %929 = vmatprep.subr.bf16.mxu0 %v4967_v33  ;;  %970 = vmatprep.subr.bf16.mxu1 %v4974_v34  ;;  %v4214_v33 = vld [vmem:[%s4773_s11 + $0x310] ss:$8 sps:$4 sm:$0xff]   ;;  %v4219_v34 = vld [vmem:[%s4773_s11 + $0x204] ss:$8 sps:$4 sm:$0xff]  }
  0x76   : > { %930 = vmatpush2.bf16.msra.mxu0 %v4979_v35  ;;  %971 = vmatpush2.bf16.msra.mxu1 %v4984_v36  ;;  %v4222_v35 = vld [vmem:[%s4773_s11 + $0x304] ss:$8 sps:$4 sm:$0xff]   ;;  %v4217_v36 = vld [vmem:[%s4773_s11 + $0x200] ss:$8 sps:$4 sm:$0xff]  }
  0x77   : > { %931 = vmatprep.subr.bf16.mxu0 %v4991_v37  ;;  %972 = vmatprep.subr.bf16.mxu1 %v4998_v38  ;;  %v4220_v37 = vld [vmem:[%s4773_s11 + $0x300] ss:$8 sps:$4 sm:$0xff]   ;;  %v4225_v38 = vld [vmem:[%s4773_s11 + $0x2f4] ss:$8 sps:$4 sm:$0xff]  }
  0x7a   : > { %932 = vmatpush2.bf16.msra.mxu0 %v5003_v39  ;;  %973 = vmatpush2.bf16.msra.mxu1 %v5010_v40  ;;  %v4228_v39 = vld [vmem:[%s4773_s11 + $0x3f4] ss:$8 sps:$4 sm:$0xff]   ;;  %v4223_v40 = vld [vmem:[%s4773_s11 + $0x2f0] ss:$8 sps:$4 sm:$0xff]  }
  0x7b   : > { %933 = vmatprep.subr.bf16.mxu0 %v5015_v41  ;;  %974 = vmatprep.subr.bf16.mxu1 %v5022_v42  ;;  %v4226_v41 = vld [vmem:[%s4773_s11 + $0x3f0] ss:$8 sps:$4 sm:$0xff]   ;;  %v4231_v42 = vld [vmem:[%s4773_s11 + $0x2e4] ss:$8 sps:$4 sm:$0xff]  }
  0x7e   : > { %934 = vmatpush2.bf16.msra.mxu0 %v5027_v43  ;;  %975 = vmatpush2.bf16.msra.mxu1 %v5032_v44  ;;  %v4234_v43 = vld [vmem:[%s4773_s11 + $0x3e4] ss:$8 sps:$4 sm:$0xff]   ;;  %v4229_v44 = vld [vmem:[%s4773_s11 + $0x2e0] ss:$8 sps:$4 sm:$0xff]  }
  0x7f   : > { %935 = vmatprep.subr.bf16.mxu0 %v5039_v45  ;;  %976 = vmatprep.subr.bf16.mxu1 %v5046_v46  ;;  %v4232_v45 = vld [vmem:[%s4773_s11 + $0x3e0] ss:$8 sps:$4 sm:$0xff]   ;;  %v4237_v46 = vld [vmem:[%s4773_s11 + $0x2d4] ss:$8 sps:$4 sm:$0xff]  }
  0x82   : > { %936 = vmatpush2.bf16.msra.mxu0 %v5051_v47  ;;  %977 = vmatpush2.bf16.msra.mxu1 %v5056_v48  ;;  %v4240_v47 = vld [vmem:[%s4773_s11 + $0x3d4] ss:$8 sps:$4 sm:$0xff]   ;;  %v4235_v48 = vld [vmem:[%s4773_s11 + $0x2d0] ss:$8 sps:$4 sm:$0xff]  }
  0x83   : > { %937 = vmatprep.subr.bf16.mxu0 %v5062_v50  ;;  %978 = vmatprep.subr.bf16.mxu1 %v5067_v51  ;;  %v4243_v50 = vld [vmem:[%s4773_s11 + $0x2c4] ss:$8 sps:$4 sm:$0xff]  }
  0x84   : > { %v4246_v51 = vld [vmem:[%s4773_s11 + $0x3c4] ss:$8 sps:$4 sm:$0xff]  }
  0x86   : > { %938 = vmatpush2.bf16.msra.mxu0 %v5076_v53  ;;  %979 = vmatpush2.bf16.msra.mxu1 %v5081_v54  ;;  %v4241_v53 = vld [vmem:[%s4773_s11 + $0x2c0] ss:$8 sps:$4 sm:$0xff]  }
  0x87   : > { %939 = vmatprep.subr.bf16.mxu0 %v5086_v55  ;;  %980 = vmatprep.subr.bf16.mxu1 %v6172_v1  ;;  %v4244_v54 = vld [vmem:[%s4773_s11 + $0x3c0] ss:$8 sps:$4 sm:$0xff]   ;;  %v4249_v55 = vld [vmem:[%s4773_s11 + $0x2b4] ss:$8 sps:$4 sm:$0xff]   ;;  %v4262_v1 = vld [vmem:[%s4773_s11 + $0x390] ss:$8 sps:$4 sm:$0xff]  }
  0x8a   : > { %940 = vmatpush2.bf16.msra.mxu0 %v5100_v57  ;;  %981 = vmatpush2.bf16.msra.mxu1 %v5105_v58  ;;  %v4247_v57 = vld [vmem:[%s4773_s11 + $0x2b0] ss:$8 sps:$4 sm:$0xff]  }
  0x8b   : > { %941 = vmatprep.subr.bf16.mxu0 %v6173_v2  ;;  %982 = vmatprep.subr.bf16.mxu1 %v6174_v3  ;;  %v4250_v58 = vld [vmem:[%s4773_s11 + $0x3b0] ss:$8 sps:$4 sm:$0xff]   ;;  %v4267_v2 = vld [vmem:[%s4773_s11 + $0x284] ss:$8 sps:$4 sm:$0xff]  }
  0x8c   : > { %v4270_v3 = vld [vmem:[%s4773_s11 + $0x384] ss:$8 sps:$4 sm:$0xff]  }
  0x8e   : > { %942 = vmatpush2.bf16.msra.mxu0 %v6175_v4  ;;  %983 = vmatpush2.bf16.msra.mxu1 %v5129_v62  ;;  %v4256_v62 = vld [vmem:[%s4773_s11 + $0x3a0] ss:$8 sps:$4 sm:$0xff]  }
  0x8f   : > { %943 = vmatprep.subr.bf16.mxu0 %v5134_v63  ;;  %984 = vmatprep.subr.bf16.mxu1 %v5139_v0  ;;  %v4261_v63 = vld [vmem:[%s4773_s11 + $0x294] ss:$8 sps:$4 sm:$0xff]   ;;  %v4265_v4 = vld [vmem:[%s4773_s11 + $0x280] ss:$8 sps:$4 sm:$0xff]  }
  0x90   : > { %v4264_v0 = vld [vmem:[%s4773_s11 + $0x394] ss:$8 sps:$4 sm:$0xff]  }
  0x92   : > { %944 = vmatpush2.bf16.msra.mxu0 %v5148_v52  ;;  %985 = vmatpush2.bf16.msra.mxu1 %v5153_v56  ;;  %v4252_v56 = vld [vmem:[%s4773_s11 + $0x3b4] ss:$8 sps:$4 sm:$0xff]   ;;  %v4259_v52 = vld [vmem:[%s4773_s11 + $0x290] ss:$8 sps:$4 sm:$0xff]  }
  0x93   : > { %1424 = vmatprep.subr.bf16.mxu0 %v4177_v7  ;;  %1465 = vmatprep.subr.bf16.mxu1 %v4180_v9  ;;  %v4276_v7 = vld [vmem:[%s4773_s11 + $0x174] ss:$8 sps:$4 sm:$0xff]  }
  0x95   : > { %946 = vmatmul.mubr.bf16.vlgmr.msra.gmra.mxu0 %v3562_v5  ;;  %987 = vmatmul.mubr.bf16.vlgmr.msra.gmra.mxu1 %v3562_v5  ;;  %v4268_v5 = vld [vmem:[%s4773_s11 + $0x380] ss:$8 sps:$4 sm:$0xff]  }
  0x96   : > { %1425 = vmatpush1.bf16.msra.mxu0 %v4175_v6  ;;  %1466 = vmatpush1.bf16.msra.mxu1 %v4178_v8  ;;  %v4273_v6 = vld [vmem:[%s4773_s11 + $0x74] ss:$8 sps:$4 sm:$0xff]  }
  0x97   : > { %1426 = vmatprep.subr.bf16.mxu0 %v4183_v10  ;;  %1467 = vmatprep.subr.bf16.mxu1 %v4186_v11 }
  0x9a   : > { %1427 = vmatpush1.bf16.msra.mxu0 %v4181_v12  ;;  %1468 = vmatpush1.bf16.msra.mxu1 %v4184_v13 }
  0x9b   : > { %1428 = vmatprep.subr.bf16.mxu0 %v4189_v14  ;;  %1469 = vmatprep.subr.bf16.mxu1 %v4192_v15 }
  0x9e   : > { %1429 = vmatpush1.bf16.msra.mxu0 %v4187_v16  ;;  %1470 = vmatpush1.bf16.msra.mxu1 %v4190_v17  ;;  %v808_v16 = vlaneseq }
  0x9f   : > { %1430 = vmatprep.subr.bf16.mxu0 %v4195_v18  ;;  %1471 = vmatprep.subr.bf16.mxu1 %v4198_v19 }
  0xa0   : > { %v5302_v19 = vshrl.u32 %v808_v16, 7  ;;  %v4282_v16 = vld [vmem:[%s4773_s11 + $0x164] ss:$8 sps:$4 sm:$0xff]  }
  0xa2   : > { %1431 = vmatpush1.bf16.msra.mxu0 %v4193_v20  ;;  %1472 = vmatpush1.bf16.msra.mxu1 %v4196_v21  ;;  %6176 = vst [vmem:[#allocation6_spill] sm:$0xff] %v5302_v19 }
  0xa3   : > { %1432 = vmatprep.subr.bf16.mxu0 %v4201_v22  ;;  %1473 = vmatprep.subr.bf16.mxu1 %v4204_v23  ;;  %v5305_v22 = vsub.s32 0, %v5302_v19  ;;  %v818_v23 = vsub.s32 2, %v5302_v19 }
  0xa5   : > { %6177 = vst [vmem:[#allocation7_spill] sm:$0xff] %v5305_v22 }
  0xa6   : > { %1433 = vmatpush1.bf16.msra.mxu0 %v4199_v24  ;;  %1474 = vmatpush1.bf16.msra.mxu1 %v4202_v25 }
  0xa7   : > { %1434 = vmatprep.subr.bf16.mxu0 %v4207_v26  ;;  %1475 = vmatprep.subr.bf16.mxu1 %v4210_v27  ;;  %v364_v26 = vld [vmem:[%s6128_s2] sm:$0xf] }
  0xaa   : > { %1435 = vmatpush1.bf16.msra.mxu0 %v4205_v28  ;;  %1476 = vmatpush1.bf16.msra.mxu1 %v4208_v29 }
  0xab   : > { %1436 = vmatprep.subr.bf16.mxu0 %v4213_v30  ;;  %1477 = vmatprep.subr.bf16.mxu1 %v4216_v31 }
  0xae   : > { %1437 = vmatpush1.bf16.msra.mxu0 %v4211_v32  ;;  %1478 = vmatpush1.bf16.msra.mxu1 %v4214_v33  ;;  %v5312_v33 = vsub.s32 1, %v5302_v19 }
  0xaf   : > { %1438 = vmatprep.subr.bf16.mxu0 %v4219_v34  ;;  %1479 = vmatprep.subr.bf16.mxu1 %v4222_v35  ;;  %v822_v34 = vsub.s32 3, %v5302_v19  ;;  %v5755_v19 = vld [vmem:[%s6127_s1 + $0x120] ss:$16 sps:$4 sm:$0xff]  }
  0xb0   : > { %6178 = vst [vmem:[#allocation8_spill] sm:$0xff] %v5312_v33  ;;  %6198 = vst [vmem:[#allocation28_spill] sm:$0xff] %v5755_v19 }
  0xb2   : > { %1439 = vmatpush1.bf16.msra.mxu0 %v4217_v36  ;;  %1480 = vmatpush1.bf16.msra.mxu1 %v4220_v37 }
  0xb3   : > { %1440 = vmatprep.subr.bf16.mxu0 %v4225_v38  ;;  %1481 = vmatprep.subr.bf16.mxu1 %v4228_v39  ;;  %v5316_v39 = vrot.slane %v364_v26, %v5305_v22  ;;  %v5749_v22 = vld [vmem:[%s6127_s1 + $0x12c] ss:$16 sps:$4 sm:$0xff]  }
  0xb4   : > { %6197 = vst [vmem:[#allocation27_spill] sm:$0xff] %v5749_v22 }
  0xb6   : > { %1441 = vmatpush2.bf16.msra.mxu0 %v4223_v40  ;;  %1482 = vmatpush2.bf16.msra.mxu1 %v4226_v41  ;;  %v5318_v40 = vrot.slane %v364_v26, %v818_v23  ;;  %v4285_v23 = vld [vmem:[%s4773_s11 + $0x54] ss:$8 sps:$4 sm:$0xff]  }
  0xb7   : > { %1442 = vmatprep.subr.bf16.mxu0 %v4231_v42  ;;  %1483 = vmatprep.subr.bf16.mxu1 %v4234_v43 }
  0xba   : > { %1443 = vmatpush2.bf16.msra.mxu0 %v4229_v44  ;;  %1484 = vmatpush2.bf16.msra.mxu1 %v4232_v45 }
  0xbb   : > { %1444 = vmatprep.subr.bf16.mxu0 %v4237_v46  ;;  %1485 = vmatprep.subr.bf16.mxu1 %v4240_v47 }
  0xbe   : > { %1445 = vmatpush2.bf16.msra.mxu0 %v4235_v48  ;;  %1486 = vmatpush2.bf16.msra.mxu1 %v4238_v49 }
  0xbf   : > { %1446 = vmatprep.subr.bf16.mxu0 %v4243_v50  ;;  %1487 = vmatprep.subr.bf16.mxu1 %v4246_v51  ;;  %v5321_v51 = vrot.slane %v364_v26, %v5312_v33  ;;  %v5743_v33 = vld [vmem:[%s6127_s1 + $0x124] ss:$16 sps:$4 sm:$0xff]  }
  0xc0   : > { %6196 = vst [vmem:[#allocation26_spill] sm:$0xff] %v5743_v33 }
  0xc2   : > { %1447 = vmatpush2.bf16.msra.mxu0 %v4241_v53  ;;  %1488 = vmatpush2.bf16.msra.mxu1 %v4244_v54  ;;  %v5323_v53 = vrot.slane %v364_v26, %v822_v34  ;;  %v4286_v26 = vld [vmem:[%s4773_s11 + $0x150] ss:$8 sps:$4 sm:$0xff]  }
  0xc3   : > { %1448 = vmatprep.subr.bf16.mxu0 %v4249_v55  ;;  %1489 = vmatprep.subr.bf16.mxu1 %v4252_v56  ;;  %v4295_v34 = vld [vmem:[%s4773_s11 + $0x30] ss:$8 sps:$4 sm:$0xff]  }
  0xc6   : > { %1449 = vmatpush2.bf16.msra.mxu0 %v4247_v57  ;;  %1490 = vmatpush2.bf16.msra.mxu1 %v4250_v58 }
  0xc7   : > { %1450 = vmatprep.subr.bf16.mxu0 %v4255_v59  ;;  %1491 = vmatprep.subr.bf16.mxu1 %v4258_v60 }
  0xca   : > { %1451 = vmatpush2.bf16.msra.mxu0 %v4253_v61  ;;  %1492 = vmatpush2.bf16.msra.mxu1 %v4256_v62 }
  0xcb   : > { %1452 = vmatprep.subr.bf16.mxu0 %v4261_v63  ;;  %1493 = vmatprep.subr.bf16.mxu1 %v4264_v0 }
  0xce   : > { %1453 = vmatpush2.bf16.msra.mxu0 %v4259_v52  ;;  %1494 = vmatpush2.bf16.msra.mxu1 %v4262_v1 }
  0xcf   : > { %1454 = vmatprep.subr.bf16.mxu0 %v4267_v2  ;;  %1495 = vmatprep.subr.bf16.mxu1 %v4270_v3 }
  0xd2   : > { %1455 = vmatpush2.bf16.msra.mxu0 %v4265_v4  ;;  %1496 = vmatpush2.bf16.msra.mxu1 %v4268_v5 }
  0xd3   : > { %1826 = vmatprep.subr.bf16.mxu0 %v4273_v6  ;;  %1867 = vmatprep.subr.bf16.mxu1 %v4276_v7 }
 0x115   : > { %v5298_v8 = vpop.f32.mrf.mxu0  ;;  %v5300_v9 = vpop.f32.mrf.mxu1 }
 0x117   : > { %v729_v10 = vpop.f32.mrf.mxu0  ;;  %v770_v11 = vpop.f32.mrf.mxu1 }
 0x118   : > { %v780_v17 = vrot.slane %v729_v10, 2  ;;  %v782_v18 = vrot.slane %v770_v11, 2 }
 0x119   : > { %v731_v12 = vpop.f32.mrf.mxu0  ;;  %v772_v13 = vpop.f32.mrf.mxu1 }
 0x11a   : > { %v788_v20 = vmax.f32 %v729_v10, %v780_v17  ;;  %v790_v21 = vmax.f32 %v770_v11, %v782_v18  ;;  %v4271_v11 = vld [vmem:[%s4773_s11 + $0x70] ss:$8 sps:$4 sm:$0xff]  }
 0x11b   : > { %v732_v14 = vpop.f32.mrf.mxu0  ;;  %v773_v15 = vpop.f32.mrf.mxu1  ;;  %v4274_v12 = vld [vmem:[%s4773_s11 + $0x170] ss:$8 sps:$4 sm:$0xff]  }
 0x11c   : > { %v796_v29 = vrot.slane %v788_v20, 4  ;;  %v798_v30 = vrot.slane %v790_v21, 4  ;;  %v4279_v15 = vld [vmem:[%s4773_s11 + $0x64] ss:$8 sps:$4 sm:$0xff]  }
 0x11e   : > { %v804_v47 = vmax.f32 %v788_v20, %v796_v29  ;;  %v806_v48 = vmax.f32 %v790_v21, %v798_v30  ;;  %v4277_v20 = vld [vmem:[%s4773_s11 + $0x60] ss:$8 sps:$4 sm:$0xff]  }
 0x11f   : > { %v4280_v21 = vld [vmem:[%s4773_s11 + $0x160] ss:$8 sps:$4 sm:$0xff]  }
 0x120   : > { %v829_v62 = vadd.f32 %v5321_v51, %v804_v47  ;;  %v831_v63 = vadd.f32 %v5323_v53, %v806_v48  ;;  %v4289_v29 = vld [vmem:[%s4773_s11 + $0x40] ss:$8 sps:$4 sm:$0xff]   ;;  %v4318_v47 = vld [vmem:[%s4773_s11 + $0x104] ss:$8 sps:$4 sm:$0xff]  }
 0x121   : > { %v4292_v30 = vld [vmem:[%s4773_s11 + $0x140] ss:$8 sps:$4 sm:$0xff]  }
 0x122   : > { %v833_v5 = vmax.f32 %v829_v62, 0.0  ;;  %v835_v6 = vmax.f32 %v831_v63, 0.0  ;;  %v4313_v48 = vld [vmem:[%s4773_s11] ss:$8 sps:$4 sm:$0xff]   ;;  %v4336_v62 = vld [vmem:[%s4773_s11 + $0x1d4] ss:$8 sps:$4 sm:$0xff]  }
 0x123   : > { %v4331_v63 = vld [vmem:[%s4773_s11 + $0xd0] ss:$8 sps:$4 sm:$0xff]  }
 0x124   : > { %v837_v17 = vpack.c.bf16 %v833_v5, %v833_v5  ;;  %v839_v18 = vpack.c.bf16 %v835_v6, %v835_v6  ;;  %v4340_v5 = vld [vmem:[%s4773_s11 + $0x1c0] ss:$8 sps:$4 sm:$0xff]  }
 0x155   : > { %v947_v24 = vpop.f32.mrf.mxu0  ;;  %v988_v25 = vpop.f32.mrf.mxu1 }
 0x156   : > { %v999_v27 = vrot.slane %v947_v24, 2  ;;  %v1001_v28 = vrot.slane %v988_v25, 2 }
 0x157   : > { %v949_v31 = vpop.f32.mrf.mxu0  ;;  %v990_v32 = vpop.f32.mrf.mxu1 }
 0x158   : > { %v1007_v35 = vmax.f32 %v947_v24, %v999_v27  ;;  %v1009_v36 = vmax.f32 %v988_v25, %v1001_v28  ;;  %v1000_v37 = vrot.slane %v949_v31, 2  ;;  %v1002_v38 = vrot.slane %v990_v32, 2  ;;  %v4288_v24 = vld [vmem:[%s4773_s11 + $0x154] ss:$8 sps:$4 sm:$0xff]   ;;  %v4283_v25 = vld [vmem:[%s4773_s11 + $0x50] ss:$8 sps:$4 sm:$0xff]  }
 0x159   : > { %v951_v41 = vpop.f32.mrf.mxu0  ;;  %v992_v42 = vpop.f32.mrf.mxu1  ;;  %v4291_v27 = vld [vmem:[%s4773_s11 + $0x44] ss:$8 sps:$4 sm:$0xff]  }
 0x15a   : > { %v1015_v43 = vrot.slane %v1007_v35, 4  ;;  %v1017_v44 = vrot.slane %v1009_v36, 4  ;;  %v1008_v45 = vmax.f32 %v949_v31, %v1000_v37  ;;  %v1010_v46 = vmax.f32 %v990_v32, %v1002_v38  ;;  %v4294_v28 = vld [vmem:[%s4773_s11 + $0x144] ss:$8 sps:$4 sm:$0xff]   ;;  %v4297_v31 = vld [vmem:[%s4773_s11 + $0x34] ss:$8 sps:$4 sm:$0xff]  }
 0x15b   : > { %v952_v49 = vpop.f32.mrf.mxu0  ;;  %v993_v50 = vpop.f32.mrf.mxu1  ;;  %v4300_v32 = vld [vmem:[%s4773_s11 + $0x134] ss:$8 sps:$4 sm:$0xff]   ;;  %v4306_v37 = vld [vmem:[%s4773_s11 + $0x124] ss:$8 sps:$4 sm:$0xff]   ;;  %v4301_v38 = vld [vmem:[%s4773_s11 + $0x20] ss:$8 sps:$4 sm:$0xff]  }
 0x15c   : > { %v1023_v54 = vmax.f32 %v1007_v35, %v1015_v43  ;;  %v1025_v55 = vmax.f32 %v1009_v36, %v1017_v44  ;;  %v1016_v56 = vrot.slane %v1008_v45, 4  ;;  %v1018_v57 = vrot.slane %v1010_v46, 4  ;;  %v4298_v35 = vld [vmem:[%s4773_s11 + $0x130] ss:$8 sps:$4 sm:$0xff]   ;;  %v4303_v36 = vld [vmem:[%s4773_s11 + $0x24] ss:$8 sps:$4 sm:$0xff]  }
 0x15d   : > { %v4304_v41 = vld [vmem:[%s4773_s11 + $0x120] ss:$8 sps:$4 sm:$0xff]   ;;  %v4309_v42 = vld [vmem:[%s4773_s11 + $0x14] ss:$8 sps:$4 sm:$0xff]   ;;  %v4307_v44 = vld [vmem:[%s4773_s11 + $0x10] ss:$8 sps:$4 sm:$0xff]  }
 0x15e   : > { %v1027_v58 = vadd.f32 %v1023_v54, %v5316_v39  ;;  %v1029_v59 = vadd.f32 %v1025_v55, %v5318_v40  ;;  %v1024_v60 = vmax.f32 %v1008_v45, %v1016_v56  ;;  %v1026_v61 = vmax.f32 %v1010_v46, %v1018_v57  ;;  %v4312_v43 = vld [vmem:[%s4773_s11 + $0x114] ss:$8 sps:$4 sm:$0xff]   ;;  %v4310_v45 = vld [vmem:[%s4773_s11 + $0x110] ss:$8 sps:$4 sm:$0xff]   ;;  %v4315_v46 = vld [vmem:[%s4773_s11 + $0x4] ss:$8 sps:$4 sm:$0xff]  }
 0x15f   : > { %v4316_v49 = vld [vmem:[%s4773_s11 + $0x100] ss:$8 sps:$4 sm:$0xff]   ;;  %v4321_v50 = vld [vmem:[%s4773_s11 + $0xf4] ss:$8 sps:$4 sm:$0xff]   ;;  %v4319_v55 = vld [vmem:[%s4773_s11 + $0xf0] ss:$8 sps:$4 sm:$0xff]  }
 0x160   : > { %v1028_v0 = vadd.f32 %v1024_v60, %v5321_v51  ;;  %v1030_v52 = vadd.f32 %v1026_v61, %v5323_v53  ;;  %v1031_v1 = vmax.f32 %v1027_v58, 0.0  ;;  %v1033_v2 = vmax.f32 %v1029_v59, 0.0  ;;  %v4324_v54 = vld [vmem:[%s4773_s11 + $0x1f4] ss:$8 sps:$4 sm:$0xff]   ;;  %v4322_v56 = vld [vmem:[%s4773_s11 + $0x1f0] ss:$8 sps:$4 sm:$0xff]  }
 0x161   : > { %v4327_v57 = vld [vmem:[%s4773_s11 + $0xe4] ss:$8 sps:$4 sm:$0xff]   ;;  %v4325_v59 = vld [vmem:[%s4773_s11 + $0xe0] ss:$8 sps:$4 sm:$0xff]   ;;  %v4333_v61 = vld [vmem:[%s4773_s11 + $0xd4] ss:$8 sps:$4 sm:$0xff]  }
 0x162   : > { %v1032_v3 = vmax.f32 %v1028_v0, 0.0  ;;  %v1034_v4 = vmax.f32 %v1030_v52, 0.0  ;;  %v1035_v13 = vpack.c.bf16 %v1031_v1, %v1031_v1  ;;  %v1037_v14 = vpack.c.bf16 %v1033_v2, %v1033_v2  ;;  %v4330_v58 = vld [vmem:[%s4773_s11 + $0x1e4] ss:$8 sps:$4 sm:$0xff]   ;;  %v4328_v60 = vld [vmem:[%s4773_s11 + $0x1e0] ss:$8 sps:$4 sm:$0xff]  }
 0x163   : > { %v4334_v0 = vld [vmem:[%s4773_s11 + $0x1d0] ss:$8 sps:$4 sm:$0xff]   ;;  %v779_v52 = vrot.slane %v5298_v8, 2  ;;  %v781_v1 = vrot.slane %v5300_v9, 2  ;;  %v4339_v2 = vld [vmem:[%s4773_s11 + $0xc4] ss:$8 sps:$4 sm:$0xff]  }
 0x164   : > { %v1036_v7 = vpack.c.bf16 %v1032_v3, %v1032_v3  ;;  %v1038_v10 = vpack.c.bf16 %v1034_v4, %v1034_v4  ;;  %v4342_v3 = vld [vmem:[%s4773_s11 + $0x1c4] ss:$8 sps:$4 sm:$0xff]   ;;  %v4337_v4 = vld [vmem:[%s4773_s11 + $0xc0] ss:$8 sps:$4 sm:$0xff]  }
 0x165   : > { %v787_v6 = vmax.f32 %v5298_v8, %v779_v52  ;;  %v4351_v8 = vld [vmem:[%s4773_s11 + $0xa4] ss:$8 sps:$4 sm:$0xff]  }
 0x166   : > { %1456 = vmatprep.mubr.bf16.mxu0 %v1036_v7  ;;  %1497 = vmatprep.mubr.bf16.mxu1 %v1038_v10  ;;  %v789_v7 = vmax.f32 %v5300_v9, %v781_v1  ;;  %v4345_v10 = vld [vmem:[%s4773_s11 + $0xb4] ss:$8 sps:$4 sm:$0xff]   ;;  %v4354_v9 = vld [vmem:[%s4773_s11 + $0x1a4] ss:$8 sps:$4 sm:$0xff]   ;;  %v5539_v1 = vld [vmem:[%s6127_s1 + $0x40] ss:$16 sps:$4 sm:$0xff]  }
 0x167   : > { %1457 = vmatmul.mubr.bf16.vlgmr.msra.gmra.mxu0 %v1035_v13  ;;  %1498 = vmatmul.mubr.bf16.vlgmr.msra.gmra.mxu1 %v1037_v14  ;;  %v4346_v13 = vld [vmem:[%s4773_s11 + $0x1b0] ss:$8 sps:$4 sm:$0xff]   ;;  %v795_v14 = vrot.slane %v787_v6, 4  ;;  %v5533_v52 = vld [vmem:[%s6127_s1 + $0x4c] ss:$16 sps:$4 sm:$0xff]  }
 0x168   : > { %1827 = vmatpush1.bf16.msra.mxu0 %v4271_v11  ;;  %1868 = vmatpush1.bf16.msra.mxu1 %v4274_v12  ;;  %v4348_v11 = vld [vmem:[%s4773_s11 + $0x1b4] ss:$8 sps:$4 sm:$0xff]   ;;  %v4343_v12 = vld [vmem:[%s4773_s11 + $0xb0] ss:$8 sps:$4 sm:$0xff]  }
 0x169   : > { %1858 = vmatprep.mubr.bf16.mxu0 %v837_v17  ;;  %1899 = vmatprep.mubr.bf16.mxu1 %v839_v18  ;;  %v4352_v17 = vld [vmem:[%s4773_s11 + $0x1a0] ss:$8 sps:$4 sm:$0xff]   ;;  %v803_v18 = vmax.f32 %v787_v6, %v795_v14  ;;  %v5605_v14 = vld [vmem:[%s6127_s1 + $0x1ec] ss:$16 sps:$4 sm:$0xff]  }
 0x16a   : > { %1828 = vmatprep.subr.bf16.mxu0 %v4279_v15  ;;  %1869 = vmatprep.subr.bf16.mxu1 %v4282_v16  ;;  %v797_v15 = vrot.slane %v789_v7, 4  ;;  %v4349_v16 = vld [vmem:[%s4773_s11 + $0xa0] ss:$8 sps:$4 sm:$0xff]  }
 0x16b   : > { %v5569_v6 = vld [vmem:[%s6127_s1 + $0x28] ss:$16 sps:$4 sm:$0xff]  }
 0x16c   : > { %1829 = vmatpush1.bf16.msra.mxu0 %v4277_v20  ;;  %1870 = vmatpush1.bf16.msra.mxu1 %v4280_v21  ;;  %v805_v20 = vmax.f32 %v789_v7, %v797_v15  ;;  %v4357_v21 = vld [vmem:[%s4773_s11 + $0x94] ss:$8 sps:$4 sm:$0xff]   ;;  %v5611_v15 = vld [vmem:[%s6127_s1 + $0x1e0] ss:$16 sps:$4 sm:$0xff]  }
 0x16d   : > { %1830 = vmatprep.subr.bf16.mxu0 %v4285_v23  ;;  %1871 = vmatprep.subr.bf16.mxu1 %v4288_v24  ;;  %v4360_v23 = vld [vmem:[%s4773_s11 + $0x194] ss:$8 sps:$4 sm:$0xff]   ;;  %v4355_v24 = vld [vmem:[%s4773_s11 + $0x90] ss:$8 sps:$4 sm:$0xff]  }
 0x16e   : > { %v5575_v7 = vld [vmem:[%s6127_s1 + $0x4] ss:$16 sps:$4 sm:$0xff]  }
 0x170   : > { %1831 = vmatpush1.bf16.msra.mxu0 %v4283_v25  ;;  %1872 = vmatpush1.bf16.msra.mxu1 %v4286_v26  ;;  %v4358_v25 = vld [vmem:[%s4773_s11 + $0x190] ss:$8 sps:$4 sm:$0xff]   ;;  %v828_v26 = vadd.f32 %v5316_v39, %v803_v18 }
 0x171   : > { %1832 = vmatprep.subr.bf16.mxu0 %v4291_v27  ;;  %1873 = vmatprep.subr.bf16.mxu1 %v4294_v28  ;;  %v830_v27 = vadd.f32 %v5318_v40, %v805_v20  ;;  %v4363_v28 = vld [vmem:[%s4773_s11 + $0x84] ss:$8 sps:$4 sm:$0xff]   ;;  %v5641_v18 = vld [vmem:[%s6127_s1 + $0x1c8] ss:$16 sps:$4 sm:$0xff]  }
 0x172   : > { %6179 = vst [vmem:[#allocation9_spill] sm:$0xff] %v5641_v18  ;;  %v5647_v20 = vld [vmem:[%s6127_s1 + $0x1a4] ss:$16 sps:$4 sm:$0xff]  }
 0x173   : > { %6180 = vst [vmem:[#allocation10_spill] sm:$0xff] %v5647_v20 }
 0x174   : > { %1833 = vmatpush1.bf16.msra.mxu0 %v4289_v29  ;;  %1874 = vmatpush1.bf16.msra.mxu1 %v4292_v30  ;;  %v4366_v29 = vld [vmem:[%s4773_s11 + $0x184] ss:$8 sps:$4 sm:$0xff]   ;;  %v4361_v30 = vld [vmem:[%s4773_s11 + $0x80] ss:$8 sps:$4 sm:$0xff]  }
 0x175   : > { %1834 = vmatprep.subr.bf16.mxu0 %v4297_v31  ;;  %1875 = vmatprep.subr.bf16.mxu1 %v4300_v32  ;;  %v4364_v31 = vld [vmem:[%s4773_s11 + $0x180] ss:$8 sps:$4 sm:$0xff]   ;;  %v832_v32 = vmax.f32 %v828_v26, 0.0  ;;  %v5677_v26 = vld [vmem:[%s6127_s1 + $0x18c] ss:$16 sps:$4 sm:$0xff]  }
 0x176   : > { %6185 = vst [vmem:[#allocation15_spill] sm:$0xff] %v5677_v26 }
 0x178   : > { %1835 = vmatpush1.bf16.msra.mxu0 %v4295_v34  ;;  %1876 = vmatpush1.bf16.msra.mxu1 %v4298_v35  ;;  %v834_v34 = vmax.f32 %v830_v27, 0.0  ;;  %v5400_v35 = vld [vmem:[%s4768_s8 + $0x10] sm:$0xff] }
 0x179   : > { %1836 = vmatprep.subr.bf16.mxu0 %v4303_v36  ;;  %1877 = vmatprep.subr.bf16.mxu1 %v4306_v37  ;;  %v836_v36 = vpack.c.bf16 %v832_v32, %v832_v32  ;;  %v5683_v27 = vld [vmem:[%s6127_s1 + $0x180] ss:$16 sps:$4 sm:$0xff]   ;;  %v5713_v32 = vld [vmem:[%s6127_s1 + $0x168] ss:$16 sps:$4 sm:$0xff]  }
 0x17a   : > { %v838_v37 = vpack.c.bf16 %v834_v34, %v834_v34  ;;  %6186 = vst [vmem:[#allocation16_spill] sm:$0xff] %v5683_v27  ;;  %6191 = vst [vmem:[#allocation21_spill] sm:$0xff] %v5713_v32  ;;  %v5719_v34 = vld [vmem:[%s6127_s1 + $0x144] ss:$16 sps:$4 sm:$0xff]  }
 0x17b   : > { %6192 = vst [vmem:[#allocation22_spill] sm:$0xff] %v5719_v34 }
 0x17c   : > { %1837 = vmatpush1.bf16.msra.mxu0 %v4301_v38  ;;  %1878 = vmatpush1.bf16.msra.mxu1 %v4304_v41  ;;  %v5405_v38 = vld [vmem:[%s6127_s1 + $0xe4] ss:$16 sps:$4 sm:$0xff]   ;;  %v5411_v41 = vld [vmem:[%s6127_s1 + $0xec] ss:$16 sps:$4 sm:$0xff]  }
 0x17d   : > { %1838 = vmatprep.subr.bf16.mxu0 %v4309_v42  ;;  %1879 = vmatprep.subr.bf16.mxu1 %v4312_v43  ;;  %v3758_v42 = vcombine.high %v5400_v35, %v5400_v35  ;;  %v5419_v43 = vld [vmem:[%s6127_s1 + $0xe0] ss:$16 sps:$4 sm:$0xff]  }
 0x180   : > { %1839 = vmatpush1.bf16.msra.mxu0 %v4307_v44  ;;  %1880 = vmatpush1.bf16.msra.mxu1 %v4310_v45  ;;  %v5425_v44 = vld [vmem:[%s6127_s1 + $0xe8] ss:$16 sps:$4 sm:$0xff]   ;;  %v5431_v45 = vld [vmem:[%s6127_s1 + $0xc4] ss:$16 sps:$4 sm:$0xff]  }
 0x181   : > { %1840 = vmatprep.subr.bf16.mxu0 %v4315_v46  ;;  %1881 = vmatprep.subr.bf16.mxu1 %v4318_v47  ;;  %v5437_v46 = vld [vmem:[%s6127_s1 + $0xcc] ss:$16 sps:$4 sm:$0xff]   ;;  %v5443_v47 = vld [vmem:[%s6127_s1 + $0xc0] ss:$16 sps:$4 sm:$0xff]  }
 0x184   : > { %1841 = vmatpush1.bf16.msra.mxu0 %v4313_v48  ;;  %1882 = vmatpush1.bf16.msra.mxu1 %v4316_v49  ;;  %v5449_v48 = vld [vmem:[%s6127_s1 + $0xc8] ss:$16 sps:$4 sm:$0xff]   ;;  %v5455_v49 = vld [vmem:[%s6127_s1 + $0xa4] ss:$16 sps:$4 sm:$0xff]  }
 0x185   : > { %1842 = vmatprep.subr.bf16.mxu0 %v4321_v50  ;;  %1883 = vmatprep.subr.bf16.mxu1 %v4324_v54  ;;  %v5461_v50 = vld [vmem:[%s6127_s1 + $0xac] ss:$16 sps:$4 sm:$0xff]   ;;  %v5467_v54 = vld [vmem:[%s6127_s1 + $0xa0] ss:$16 sps:$4 sm:$0xff]  }
 0x188   : > { %1843 = vmatpush2.bf16.msra.mxu0 %v4319_v55  ;;  %1884 = vmatpush2.bf16.msra.mxu1 %v4322_v56  ;;  %v5473_v55 = vld [vmem:[%s6127_s1 + $0xa8] ss:$16 sps:$4 sm:$0xff]   ;;  %v5479_v56 = vld [vmem:[%s6127_s1 + $0x84] ss:$16 sps:$4 sm:$0xff]  }
 0x189   : > { %1844 = vmatprep.subr.bf16.mxu0 %v4327_v57  ;;  %1885 = vmatprep.subr.bf16.mxu1 %v4330_v58  ;;  %v5485_v57 = vld [vmem:[%s6127_s1 + $0x8c] ss:$16 sps:$4 sm:$0xff]   ;;  %v5491_v58 = vld [vmem:[%s6127_s1 + $0x80] ss:$16 sps:$4 sm:$0xff]  }
 0x18c   : > { %1845 = vmatpush2.bf16.msra.mxu0 %v4325_v59  ;;  %1886 = vmatpush2.bf16.msra.mxu1 %v4328_v60  ;;  %v5497_v59 = vld [vmem:[%s6127_s1 + $0x88] ss:$16 sps:$4 sm:$0xff]   ;;  %v5503_v60 = vld [vmem:[%s6127_s1 + $0x64] ss:$16 sps:$4 sm:$0xff]  }
 0x18d   : > { %1846 = vmatprep.subr.bf16.mxu0 %v4333_v61  ;;  %1887 = vmatprep.subr.bf16.mxu1 %v4336_v62  ;;  %v5509_v61 = vld [vmem:[%s6127_s1 + $0x6c] ss:$16 sps:$4 sm:$0xff]   ;;  %v5515_v62 = vld [vmem:[%s6127_s1 + $0x60] ss:$16 sps:$4 sm:$0xff]  }
 0x190   : > { %1847 = vmatpush2.bf16.msra.mxu0 %v4331_v63  ;;  %1888 = vmatpush2.bf16.msra.mxu1 %v4334_v0  ;;  %v5521_v63 = vld [vmem:[%s6127_s1 + $0x68] ss:$16 sps:$4 sm:$0xff]   ;;  %v5527_v0 = vld [vmem:[%s6127_s1 + $0x44] ss:$16 sps:$4 sm:$0xff]  }
 0x191   : > { %1848 = vmatprep.subr.bf16.mxu0 %v4339_v2  ;;  %1889 = vmatprep.subr.bf16.mxu1 %v4342_v3  ;;  %v5545_v2 = vld [vmem:[%s6127_s1 + $0x48] ss:$16 sps:$4 sm:$0xff]   ;;  %v5551_v3 = vld [vmem:[%s6127_s1 + $0x24] ss:$16 sps:$4 sm:$0xff]  }
 0x194   : > { %1849 = vmatpush2.bf16.msra.mxu0 %v4337_v4  ;;  %1890 = vmatpush2.bf16.msra.mxu1 %v4340_v5  ;;  %v5557_v4 = vld [vmem:[%s6127_s1 + $0x2c] ss:$16 sps:$4 sm:$0xff]   ;;  %v5563_v5 = vld [vmem:[%s6127_s1 + $0x20] ss:$16 sps:$4 sm:$0xff]  }
 0x195   : > { %1850 = vmatprep.subr.bf16.mxu0 %v4345_v10  ;;  %1891 = vmatprep.subr.bf16.mxu1 %v4348_v11  ;;  %v5581_v10 = vld [vmem:[%s6127_s1 + $0xc] ss:$16 sps:$4 sm:$0xff]   ;;  %v5587_v11 = vld [vmem:[%s6127_s1] ss:$16 sps:$4 sm:$0xff]  }
 0x198   : > { %1851 = vmatpush2.bf16.msra.mxu0 %v4343_v12  ;;  %1892 = vmatpush2.bf16.msra.mxu1 %v4346_v13  ;;  %v5593_v12 = vld [vmem:[%s6127_s1 + $0x8] ss:$16 sps:$4 sm:$0xff]   ;;  %v5599_v13 = vld [vmem:[%s6127_s1 + $0x1e4] ss:$16 sps:$4 sm:$0xff]  }
 0x199   : > { %1852 = vmatprep.subr.bf16.mxu0 %v4351_v8  ;;  %1893 = vmatprep.subr.bf16.mxu1 %v4354_v9  ;;  %v5617_v8 = vld [vmem:[%s6127_s1 + $0x1e8] ss:$16 sps:$4 sm:$0xff]   ;;  %v5623_v9 = vld [vmem:[%s6127_s1 + $0x1c4] ss:$16 sps:$4 sm:$0xff]  }
 0x19c   : > { %1853 = vmatpush2.bf16.msra.mxu0 %v4349_v16  ;;  %1894 = vmatpush2.bf16.msra.mxu1 %v4352_v17  ;;  %v5629_v16 = vld [vmem:[%s6127_s1 + $0x1cc] ss:$16 sps:$4 sm:$0xff]   ;;  %v5635_v17 = vld [vmem:[%s6127_s1 + $0x1c0] ss:$16 sps:$4 sm:$0xff]  }
 0x19d   : > { %1854 = vmatprep.subr.bf16.mxu0 %v4357_v21  ;;  %1895 = vmatprep.subr.bf16.mxu1 %v4360_v23  ;;  %v5653_v21 = vld [vmem:[%s6127_s1 + $0x1ac] ss:$16 sps:$4 sm:$0xff]   ;;  %v5659_v23 = vld [vmem:[%s6127_s1 + $0x1a0] ss:$16 sps:$4 sm:$0xff]  }
 0x19e   : > { %6181 = vst [vmem:[#allocation11_spill] sm:$0xff] %v5653_v21  ;;  %6182 = vst [vmem:[#allocation12_spill] sm:$0xff] %v5659_v23 }
 0x1a0   : > { %1855 = vmatpush2.bf16.msra.mxu0 %v4355_v24  ;;  %1896 = vmatpush2.bf16.msra.mxu1 %v4358_v25  ;;  %v5665_v24 = vld [vmem:[%s6127_s1 + $0x1a8] ss:$16 sps:$4 sm:$0xff]   ;;  %v5671_v25 = vld [vmem:[%s6127_s1 + $0x184] ss:$16 sps:$4 sm:$0xff]  }
 0x1a1   : > { %1856 = vmatprep.subr.bf16.mxu0 %v4363_v28  ;;  %1897 = vmatprep.subr.bf16.mxu1 %v4366_v29  ;;  %6183 = vst [vmem:[#allocation13_spill] sm:$0xff] %v5665_v24  ;;  %6184 = vst [vmem:[#allocation14_spill] sm:$0xff] %v5671_v25  ;;  %v5689_v28 = vld [vmem:[%s6127_s1 + $0x188] ss:$16 sps:$4 sm:$0xff]   ;;  %v5695_v29 = vld [vmem:[%s6127_s1 + $0x164] ss:$16 sps:$4 sm:$0xff]  }
 0x1a2   : > { %6187 = vst [vmem:[#allocation17_spill] sm:$0xff] %v5689_v28  ;;  %6188 = vst [vmem:[#allocation18_spill] sm:$0xff] %v5695_v29 }
 0x1a4   : > { %1857 = vmatpush2.bf16.msra.mxu0 %v4361_v30  ;;  %1898 = vmatpush2.bf16.msra.mxu1 %v4364_v31  ;;  %v5701_v30 = vld [vmem:[%s6127_s1 + $0x16c] ss:$16 sps:$4 sm:$0xff]   ;;  %v5707_v31 = vld [vmem:[%s6127_s1 + $0x160] ss:$16 sps:$4 sm:$0xff]  }
 0x1a5   : > { %1917 = vmatprep.subr.bf16.mxu0 %v5405_v38  ;;  %1958 = vmatprep.subr.bf16.mxu1 %v5411_v41  ;;  %6189 = vst [vmem:[#allocation19_spill] sm:$0xff] %v5701_v30  ;;  %6190 = vst [vmem:[#allocation20_spill] sm:$0xff] %v5707_v31 }
 0x1a7   : > { %1859 = vmatmul.mubr.bf16.vlgmr.msra.gmra.mxu0 %v836_v36  ;;  %1900 = vmatmul.mubr.bf16.vlgmr.msra.gmra.mxu1 %v838_v37  ;;  %v5725_v36 = vld [vmem:[%s6127_s1 + $0x14c] ss:$16 sps:$4 sm:$0xff]   ;;  %v5731_v37 = vld [vmem:[%s6127_s1 + $0x140] ss:$16 sps:$4 sm:$0xff]  }
 0x1a8   : > { %1918 = vmatpush1.bf16.msra.mxu0 %v5419_v43  ;;  %1959 = vmatpush1.bf16.msra.mxu1 %v5425_v44  ;;  %6193 = vst [vmem:[#allocation23_spill] sm:$0xff] %v5725_v36  ;;  %6194 = vst [vmem:[#allocation24_spill] sm:$0xff] %v5731_v37 }
 0x1a9   : > { %1919 = vmatprep.subr.bf16.mxu0 %v5431_v45  ;;  %1960 = vmatprep.subr.bf16.mxu1 %v5437_v46 }
 0x1aa   : > { %1949 = vmatprep.mubr.bf16.mxu0 %v3758_v42  ;;  %1990 = vmatprep.mubr.bf16.mxu1 %v3758_v42  ;;  %v5737_v42 = vld [vmem:[%s6127_s1 + $0x148] ss:$16 sps:$4 sm:$0xff]  }
 0x1ab   : > { %6195 = vst [vmem:[#allocation25_spill] sm:$0xff] %v5737_v42 }
 0x1ac   : > { %1920 = vmatpush1.bf16.msra.mxu0 %v5443_v47  ;;  %1961 = vmatpush1.bf16.msra.mxu1 %v5449_v48 }
 0x1ad   : > { %1921 = vmatprep.subr.bf16.mxu0 %v5455_v49  ;;  %1962 = vmatprep.subr.bf16.mxu1 %v5461_v50 }
 0x1b0   : > { %1922 = vmatpush1.bf16.msra.mxu0 %v5467_v54  ;;  %1963 = vmatpush1.bf16.msra.mxu1 %v5473_v55 }
 0x1b1   : > { %1923 = vmatprep.subr.bf16.mxu0 %v5479_v56  ;;  %1964 = vmatprep.subr.bf16.mxu1 %v5485_v57 }
 0x1b4   : > { %1924 = vmatpush1.bf16.msra.mxu0 %v5491_v58  ;;  %1965 = vmatpush1.bf16.msra.mxu1 %v5497_v59 }
 0x1b5   : > { %1925 = vmatprep.subr.bf16.mxu0 %v5503_v60  ;;  %1966 = vmatprep.subr.bf16.mxu1 %v5509_v61 }
 0x1b8   : > { %1926 = vmatpush1.bf16.msra.mxu0 %v5515_v62  ;;  %1967 = vmatpush1.bf16.msra.mxu1 %v5521_v63 }
 0x1b9   : > { %1927 = vmatprep.subr.bf16.mxu0 %v5527_v0  ;;  %1968 = vmatprep.subr.bf16.mxu1 %v5533_v52 }
 0x1bc   : > { %1928 = vmatpush1.bf16.msra.mxu0 %v5539_v1  ;;  %1969 = vmatpush1.bf16.msra.mxu1 %v5545_v2 }
 0x1bd   : > { %1929 = vmatprep.subr.bf16.mxu0 %v5551_v3  ;;  %1970 = vmatprep.subr.bf16.mxu1 %v5557_v4 }
 0x1c0   : > { %1930 = vmatpush1.bf16.msra.mxu0 %v5563_v5  ;;  %1971 = vmatpush1.bf16.msra.mxu1 %v5569_v6 }
 0x1c1   : > { %1931 = vmatprep.subr.bf16.mxu0 %v5575_v7  ;;  %1972 = vmatprep.subr.bf16.mxu1 %v5581_v10 }
 0x1c4   : > { %1932 = vmatpush1.bf16.msra.mxu0 %v5587_v11  ;;  %1973 = vmatpush1.bf16.msra.mxu1 %v5593_v12 }
 0x1c5   : > { %1933 = vmatprep.subr.bf16.mxu0 %v5599_v13  ;;  %1974 = vmatprep.subr.bf16.mxu1 %v5605_v14 }
 0x1c8   : > { %1934 = vmatpush2.bf16.msra.mxu0 %v5611_v15  ;;  %1975 = vmatpush2.bf16.msra.mxu1 %v5617_v8 }
 0x1c9   : > { %1935 = vmatprep.subr.bf16.mxu0 %v5623_v9  ;;  %1976 = vmatprep.subr.bf16.mxu1 %v5629_v16 }
 0x1cc   : > { %1936 = vmatpush2.bf16.msra.mxu0 %v5635_v17  ;;  %1977 = vmatpush2.bf16.msra.mxu1 %v5641_v18 }
 0x1cd   : > { %1937 = vmatprep.subr.bf16.mxu0 %v5647_v20  ;;  %1978 = vmatprep.subr.bf16.mxu1 %v5653_v21 }
 0x1d0   : > { %1938 = vmatpush2.bf16.msra.mxu0 %v5659_v23  ;;  %1979 = vmatpush2.bf16.msra.mxu1 %v5665_v24 }
 0x1d1   : > { %1939 = vmatprep.subr.bf16.mxu0 %v5671_v25  ;;  %1980 = vmatprep.subr.bf16.mxu1 %v5677_v26  ;;  %v4447_v26 = vld [vmem:[%s4773_s11 + $0x4a0] ss:$8 sps:$4 sm:$0xff]  }
 0x1d2   : > { %v4450_v25 = vld [vmem:[%s4773_s11 + $0x5a0] ss:$8 sps:$4 sm:$0xff]  }
 0x1d4   : > { %1940 = vmatpush2.bf16.msra.mxu0 %v5683_v27  ;;  %1981 = vmatpush2.bf16.msra.mxu1 %v5689_v28  ;;  %v4444_v28 = vld [vmem:[%s4773_s11 + $0x5b0] ss:$8 sps:$4 sm:$0xff]  }
 0x1d5   : > { %1941 = vmatprep.subr.bf16.mxu0 %v5695_v29  ;;  %1982 = vmatprep.subr.bf16.mxu1 %v5701_v30  ;;  %v4381_v30 = vld [vmem:[%s4773_s11 + $0x450] ss:$8 sps:$4 sm:$0xff]  }
 0x1d6   : > { %v4441_v29 = vld [vmem:[%s4773_s11 + $0x4b0] ss:$8 sps:$4 sm:$0xff]  }
 0x1d8   : > { %1942 = vmatpush2.bf16.msra.mxu0 %v5707_v31  ;;  %1983 = vmatpush2.bf16.msra.mxu1 %v5713_v32  ;;  %v4375_v32 = vld [vmem:[%s4773_s11 + $0x460] ss:$8 sps:$4 sm:$0xff]   ;;  %v4386_v31 = vld [vmem:[%s4773_s11 + $0x554] ss:$8 sps:$4 sm:$0xff]  }
 0x1d9   : > { %1943 = vmatprep.subr.bf16.mxu0 %v5719_v34  ;;  %1984 = vmatprep.subr.bf16.mxu1 %v5725_v36  ;;  %v4374_v36 = vld [vmem:[%s4773_s11 + $0x574] ss:$8 sps:$4 sm:$0xff]   ;;  %v4377_v34 = vld [vmem:[%s4773_s11 + $0x464] ss:$8 sps:$4 sm:$0xff]  }
 0x1dc   : > { %1944 = vmatpush2.bf16.msra.mxu0 %v5731_v37  ;;  %1985 = vmatpush2.bf16.msra.mxu1 %v5737_v42  ;;  %v3757_v42 = vcombine.low %v5400_v35, %v5400_v35  ;;  %v4369_v35 = vld [vmem:[%s4773_s11 + $0x470] ss:$8 sps:$4 sm:$0xff]  }
 0x1dd   : > { %1945 = vmatprep.subr.bf16.mxu0 %v5743_v33  ;;  %1986 = vmatprep.subr.bf16.mxu1 %v5749_v22  ;;  %v5761_v33 = vld [vmem:[%s6127_s1 + $0x128] ss:$16 sps:$4 sm:$0xff]   ;;  %v5767_v22 = vld [vmem:[%s6127_s1 + $0x104] ss:$16 sps:$4 sm:$0xff]  }
 0x1de   : > { %6199 = vst [vmem:[#allocation29_spill] sm:$0xff] %v5761_v33  ;;  %6200 = vst [vmem:[#allocation30_spill] sm:$0xff] %v5767_v22  ;;  %v4372_v37 = vld [vmem:[%s4773_s11 + $0x570] ss:$8 sps:$4 sm:$0xff]  }
 0x1e0   : > { %1946 = vmatpush2.bf16.msra.mxu0 %v5755_v19  ;;  %1987 = vmatpush2.bf16.msra.mxu1 %v5761_v33  ;;  %v5773_v19 = vld [vmem:[%s6127_s1 + $0x10c] ss:$16 sps:$4 sm:$0xff]   ;;  %v5781_v33 = vld [vmem:[%s6127_s1 + $0x100] ss:$16 sps:$4 sm:$0xff]  }
 0x1e1   : > { %1947 = vmatprep.subr.bf16.mxu0 %v5767_v22  ;;  %6201 = vst [vmem:[#allocation31_spill] sm:$0xff] %v5773_v19  ;;  %1988 = vmatprep.subr.bf16.mxu1 %v5773_v19  ;;  %6202 = vst [vmem:[#allocation32_spill] sm:$0xff] %v5781_v33  ;;  %v5787_v22 = vld [vmem:[%s6127_s1 + $0x108] ss:$16 sps:$4 sm:$0xff]   ;;  %v4371_v19 = vld [vmem:[%s4773_s11 + $0x474] ss:$8 sps:$4 sm:$0xff]  }
 0x1e2   : > { %6203 = vst [vmem:[#allocation33_spill] sm:$0xff] %v5787_v22 }
 0x1e4   : > { %1948 = vmatpush2.bf16.msra.mxu0 %v5781_v33  ;;  %1989 = vmatpush2.bf16.msra.mxu1 %v5787_v22  ;;  %v4380_v33 = vld [vmem:[%s4773_s11 + $0x564] ss:$8 sps:$4 sm:$0xff]   ;;  %v4378_v22 = vld [vmem:[%s4773_s11 + $0x560] ss:$8 sps:$4 sm:$0xff]  }
 0x1e5   : > { %2428 = vmatprep.subr.bf16.mxu0 %v4371_v19  ;;  %2469 = vmatprep.subr.bf16.mxu1 %v4374_v36  ;;  %v4384_v19 = vld [vmem:[%s4773_s11 + $0x550] ss:$8 sps:$4 sm:$0xff]   ;;  %v4389_v36 = vld [vmem:[%s4773_s11 + $0x444] ss:$8 sps:$4 sm:$0xff]  }
 0x1e7   : > { %1950 = vmatmul.mubr.bf16.vlgmr.msra.gmra.mxu0 %v3757_v42  ;;  %1991 = vmatmul.mubr.bf16.vlgmr.msra.gmra.mxu1 %v3757_v42  ;;  %v4383_v42 = vld [vmem:[%s4773_s11 + $0x454] ss:$8 sps:$4 sm:$0xff]  }
 0x1e8   : > { %2429 = vmatpush1.bf16.msra.mxu0 %v4369_v35  ;;  %2470 = vmatpush1.bf16.msra.mxu1 %v4372_v37  ;;  %v4392_v35 = vld [vmem:[%s4773_s11 + $0x544] ss:$8 sps:$4 sm:$0xff]   ;;  %v4395_v37 = vld [vmem:[%s4773_s11 + $0x434] ss:$8 sps:$4 sm:$0xff]  }
 0x1e9   : > { %2430 = vmatprep.subr.bf16.mxu0 %v4377_v34  ;;  %2471 = vmatprep.subr.bf16.mxu1 %v4380_v33  ;;  %v4387_v34 = vld [vmem:[%s4773_s11 + $0x440] ss:$8 sps:$4 sm:$0xff]  }
 0x1ea   : > { %v4390_v33 = vld [vmem:[%s4773_s11 + $0x540] ss:$8 sps:$4 sm:$0xff]  }
 0x1ec   : > { %2431 = vmatpush1.bf16.msra.mxu0 %v4375_v32  ;;  %2472 = vmatpush1.bf16.msra.mxu1 %v4378_v22  ;;  %v4398_v32 = vld [vmem:[%s4773_s11 + $0x534] ss:$8 sps:$4 sm:$0xff]   ;;  %v4393_v22 = vld [vmem:[%s4773_s11 + $0x430] ss:$8 sps:$4 sm:$0xff]  }
 0x1ed   : > { %2432 = vmatprep.subr.bf16.mxu0 %v4383_v42  ;;  %2473 = vmatprep.subr.bf16.mxu1 %v4386_v31  ;;  %v4396_v31 = vld [vmem:[%s4773_s11 + $0x530] ss:$8 sps:$4 sm:$0xff]   ;;  %v4401_v42 = vld [vmem:[%s4773_s11 + $0x424] ss:$8 sps:$4 sm:$0xff]  }
 0x1f0   : > { %2433 = vmatpush1.bf16.msra.mxu0 %v4381_v30  ;;  %2474 = vmatpush1.bf16.msra.mxu1 %v4384_v19  ;;  %v4404_v30 = vld [vmem:[%s4773_s11 + $0x524] ss:$8 sps:$4 sm:$0xff]   ;;  %v4399_v19 = vld [vmem:[%s4773_s11 + $0x420] ss:$8 sps:$4 sm:$0xff]  }
 0x1f1   : > { %2434 = vmatprep.subr.bf16.mxu0 %v4389_v36  ;;  %2475 = vmatprep.subr.bf16.mxu1 %v4392_v35  ;;  %v4402_v36 = vld [vmem:[%s4773_s11 + $0x520] ss:$8 sps:$4 sm:$0xff]   ;;  %v4407_v35 = vld [vmem:[%s4773_s11 + $0x414] ss:$8 sps:$4 sm:$0xff]  }
 0x1f4   : > { %2435 = vmatpush1.bf16.msra.mxu0 %v4387_v34  ;;  %2476 = vmatpush1.bf16.msra.mxu1 %v4390_v33  ;;  %v4410_v34 = vld [vmem:[%s4773_s11 + $0x514] ss:$8 sps:$4 sm:$0xff]   ;;  %v4405_v33 = vld [vmem:[%s4773_s11 + $0x410] ss:$8 sps:$4 sm:$0xff]  }
 0x1f5   : > { %2436 = vmatprep.subr.bf16.mxu0 %v4395_v37  ;;  %2477 = vmatprep.subr.bf16.mxu1 %v4398_v32  ;;  %v4408_v37 = vld [vmem:[%s4773_s11 + $0x510] ss:$8 sps:$4 sm:$0xff]   ;;  %v4413_v32 = vld [vmem:[%s4773_s11 + $0x404] ss:$8 sps:$4 sm:$0xff]  }
 0x1f8   : > { %2437 = vmatpush1.bf16.msra.mxu0 %v4393_v22  ;;  %2478 = vmatpush1.bf16.msra.mxu1 %v4396_v31  ;;  %v4416_v22 = vld [vmem:[%s4773_s11 + $0x504] ss:$8 sps:$4 sm:$0xff]   ;;  %v4411_v31 = vld [vmem:[%s4773_s11 + $0x400] ss:$8 sps:$4 sm:$0xff]  }
 0x1f9   : > { %2438 = vmatprep.subr.bf16.mxu0 %v4401_v42  ;;  %2479 = vmatprep.subr.bf16.mxu1 %v4404_v30  ;;  %v4414_v42 = vld [vmem:[%s4773_s11 + $0x500] ss:$8 sps:$4 sm:$0xff]   ;;  %v4419_v30 = vld [vmem:[%s4773_s11 + $0x4f4] ss:$8 sps:$4 sm:$0xff]  }
 0x1fc   : > { %2439 = vmatpush1.bf16.msra.mxu0 %v4399_v19  ;;  %2480 = vmatpush1.bf16.msra.mxu1 %v4402_v36  ;;  %v4422_v19 = vld [vmem:[%s4773_s11 + $0x5f4] ss:$8 sps:$4 sm:$0xff]   ;;  %v4417_v36 = vld [vmem:[%s4773_s11 + $0x4f0] ss:$8 sps:$4 sm:$0xff]  }
 0x1fd   : > { %2440 = vmatprep.subr.bf16.mxu0 %v4407_v35  ;;  %2481 = vmatprep.subr.bf16.mxu1 %v4410_v34  ;;  %v4420_v35 = vld [vmem:[%s4773_s11 + $0x5f0] ss:$8 sps:$4 sm:$0xff]   ;;  %v4425_v34 = vld [vmem:[%s4773_s11 + $0x4e4] ss:$8 sps:$4 sm:$0xff]  }
 0x200   : > { %2441 = vmatpush1.bf16.msra.mxu0 %v4405_v33  ;;  %2482 = vmatpush1.bf16.msra.mxu1 %v4408_v37  ;;  %v4428_v33 = vld [vmem:[%s4773_s11 + $0x5e4] ss:$8 sps:$4 sm:$0xff]   ;;  %v4423_v37 = vld [vmem:[%s4773_s11 + $0x4e0] ss:$8 sps:$4 sm:$0xff]  }
 0x201   : > { %2442 = vmatprep.subr.bf16.mxu0 %v4413_v32  ;;  %2483 = vmatprep.subr.bf16.mxu1 %v4416_v22  ;;  %v4426_v32 = vld [vmem:[%s4773_s11 + $0x5e0] ss:$8 sps:$4 sm:$0xff]   ;;  %v4431_v22 = vld [vmem:[%s4773_s11 + $0x4d4] ss:$8 sps:$4 sm:$0xff]  }
 0x204   : > { %2443 = vmatpush1.bf16.msra.mxu0 %v4411_v31  ;;  %2484 = vmatpush1.bf16.msra.mxu1 %v4414_v42  ;;  %v4434_v31 = vld [vmem:[%s4773_s11 + $0x5d4] ss:$8 sps:$4 sm:$0xff]   ;;  %v4429_v42 = vld [vmem:[%s4773_s11 + $0x4d0] ss:$8 sps:$4 sm:$0xff]  }
 0x205   : > { %2444 = vmatprep.subr.bf16.mxu0 %v4419_v30  ;;  %2485 = vmatprep.subr.bf16.mxu1 %v4422_v19  ;;  %v4432_v30 = vld [vmem:[%s4773_s11 + $0x5d0] ss:$8 sps:$4 sm:$0xff]   ;;  %v4437_v19 = vld [vmem:[%s4773_s11 + $0x4c4] ss:$8 sps:$4 sm:$0xff]  }
 0x208   : > { %2445 = vmatpush2.bf16.msra.mxu0 %v4417_v36  ;;  %2486 = vmatpush2.bf16.msra.mxu1 %v4420_v35  ;;  %v4440_v36 = vld [vmem:[%s4773_s11 + $0x5c4] ss:$8 sps:$4 sm:$0xff]   ;;  %v4435_v35 = vld [vmem:[%s4773_s11 + $0x4c0] ss:$8 sps:$4 sm:$0xff]  }
 0x209   : > { %2446 = vmatprep.subr.bf16.mxu0 %v4425_v34  ;;  %2487 = vmatprep.subr.bf16.mxu1 %v4428_v33  ;;  %v4438_v34 = vld [vmem:[%s4773_s11 + $0x5c0] ss:$8 sps:$4 sm:$0xff]   ;;  %v4443_v33 = vld [vmem:[%s4773_s11 + $0x4b4] ss:$8 sps:$4 sm:$0xff]  }
 0x20c   : > { %2447 = vmatpush2.bf16.msra.mxu0 %v4423_v37  ;;  %2488 = vmatpush2.bf16.msra.mxu1 %v4426_v32  ;;  %v4446_v37 = vld [vmem:[%s4773_s11 + $0x5b4] ss:$8 sps:$4 sm:$0xff]  }
 0x20d   : > { %2448 = vmatprep.subr.bf16.mxu0 %v4431_v22  ;;  %2489 = vmatprep.subr.bf16.mxu1 %v4434_v31 }
 0x210   : > { %2449 = vmatpush2.bf16.msra.mxu0 %v4429_v42  ;;  %2490 = vmatpush2.bf16.msra.mxu1 %v4432_v30 }
 0x211   : > { %2450 = vmatprep.subr.bf16.mxu0 %v4437_v19  ;;  %2491 = vmatprep.subr.bf16.mxu1 %v4440_v36  ;;  %v4449_v36 = vld [vmem:[%s4773_s11 + $0x4a4] ss:$8 sps:$4 sm:$0xff]  }
 0x214   : > { %2451 = vmatpush2.bf16.msra.mxu0 %v4435_v35  ;;  %2492 = vmatpush2.bf16.msra.mxu1 %v4438_v34  ;;  %v4452_v35 = vld [vmem:[%s4773_s11 + $0x5a4] ss:$8 sps:$4 sm:$0xff]  }
 0x215   : > { %2452 = vmatprep.subr.bf16.mxu0 %v4443_v33  ;;  %2493 = vmatprep.subr.bf16.mxu1 %v4446_v37 }
 0x218   : > { %2453 = vmatpush2.bf16.msra.mxu0 %v4441_v29  ;;  %2494 = vmatpush2.bf16.msra.mxu1 %v4444_v28  ;;  %v4455_v28 = vld [vmem:[%s4773_s11 + $0x494] ss:$8 sps:$4 sm:$0xff]  }
 0x219   : > { %2454 = vmatprep.subr.bf16.mxu0 %v4449_v36  ;;  %2495 = vmatprep.subr.bf16.mxu1 %v4452_v35  ;;  %v4458_v29 = vld [vmem:[%s4773_s11 + $0x594] ss:$8 sps:$4 sm:$0xff]  }
 0x21c   : > { %2455 = vmatpush2.bf16.msra.mxu0 %v4447_v26  ;;  %2496 = vmatpush2.bf16.msra.mxu1 %v4450_v25 }
 0x21d   : > { %2456 = vmatprep.subr.bf16.mxu0 %v4455_v28  ;;  %2497 = vmatprep.subr.bf16.mxu1 %v4458_v29 }
 0x227   : > { %v1458_v32 = vpop.f32.mrf.mxu0  ;;  %v1499_v22 = vpop.f32.mrf.mxu1 }
 0x228   : > { %v1500_v31 = vadd.f32 %v1499_v22, %v1458_v32  ;;  %v4453_v32 = vld [vmem:[%s4773_s11 + $0x490] ss:$8 sps:$4 sm:$0xff]  }
 0x229   : > { %v1460_v42 = vpop.f32.mrf.mxu0  ;;  %v1501_v30 = vpop.f32.mrf.mxu1  ;;  %v4456_v22 = vld [vmem:[%s4773_s11 + $0x590] ss:$8 sps:$4 sm:$0xff]   ;;  %2457 = vmatpush2.bf16.msra.mxu0 %v4453_v32 }
 0x22a   : > { %v1502_v19 = vadd.f32 %v1501_v30, %v1460_v42  ;;  %2498 = vmatpush2.bf16.msra.mxu1 %v4456_v22  ;;  %v4464_v42 = vld [vmem:[%s4773_s11 + $0x584] ss:$8 sps:$4 sm:$0xff]   ;;  %v4459_v30 = vld [vmem:[%s4773_s11 + $0x480] ss:$8 sps:$4 sm:$0xff]  }
 0x22b   : > { %v1462_v34 = vpop.f32.mrf.mxu0  ;;  %v1503_v27 = vpop.f32.mrf.mxu1  ;;  %2499 = vmatprep.subr.bf16.mxu1 %v4464_v42 }
 0x22c   : > { %v4461_v27 = vld [vmem:[%s4773_s11 + $0x484] ss:$8 sps:$4 sm:$0xff]   ;;  %v4462_v34 = vld [vmem:[%s4773_s11 + $0x580] ss:$8 sps:$4 sm:$0xff]  }
 0x22d   : > { %v1463_v33 = vpop.f32.mrf.mxu0  ;;  %v1504_v37 = vpop.f32.mrf.mxu1  ;;  %2458 = vmatprep.subr.bf16.mxu0 %v4461_v27 }
 0x22e   : > { %2459 = vmatpush2.bf16.msra.mxu0 %v4459_v30  ;;  %2500 = vmatpush2.bf16.msra.mxu1 %v4462_v34 }
 0x22f   : > { %2521 = vmatprep.subr.bf16.mxu0 %v5405_v38  ;;  %2562 = vmatprep.subr.bf16.mxu1 %v5411_v41 }
 0x267   : > { %v1860_v25 = vpop.f32.mrf.mxu0  ;;  %v1901_v26 = vpop.f32.mrf.mxu1 }
 0x268   : > { %v1861_v36 = vadd.f32 %v1860_v25, %v1500_v31 }
 0x269   : > { %v1862_v35 = vpop.f32.mrf.mxu0  ;;  %v1903_v33 = vpop.f32.mrf.mxu1 }
 0x26a   : > { %v5856_v37 = vadd.f32 %v1901_v26, %v1861_v36  ;;  %v1863_v28 = vadd.f32 %v1862_v35, %v1502_v19 }
 0x26b   : > { %v1864_v29 = vpop.f32.mrf.mxu0  ;;  %v1905_v32 = vpop.f32.mrf.mxu1 }
 0x26c   : > { %6204 = vst [vmem:[#allocation34_spill] sm:$0xff] %v5856_v37  ;;  %v5858_v22 = vadd.f32 %v1903_v33, %v1863_v28 }
 0x26d   : > { %v1865_v27 = vpop.f32.mrf.mxu0  ;;  %v1906_v42 = vpop.f32.mrf.mxu1 }
 0x26e   : > { %6205 = vst [vmem:[#allocation35_spill] sm:$0xff] %v5858_v22 }
 0x2a7   : > { %v1951_v30 = vpop.f32.mrf.mxu0  ;;  %v1992_v34 = vpop.f32.mrf.mxu1 }
 0x2a8   : > { %v2003_v24 = vrot.slane %v1951_v30, 2  ;;  %v2005_v38 = vrot.slane %v1992_v34, 2 }
 0x2a9   : > { %v1953_v23 = vpop.f32.mrf.mxu0  ;;  %v1994_v41 = vpop.f32.mrf.mxu1 }
 0x2aa   : > { %v2011_v21 = vmax.f32 %v1951_v30, %v2003_v24  ;;  %v2013_v20 = vmax.f32 %v1992_v34, %v2005_v38  ;;  %v2004_v31 = vrot.slane %v1953_v23, 2  ;;  %v2006_v25 = vrot.slane %v1994_v41, 2 }
 0x2ab   : > { %v1955_v18 = vpop.f32.mrf.mxu0  ;;  %v1996_v26 = vpop.f32.mrf.mxu1 }
 0x2ac   : > { %v2019_v36 = vrot.slane %v2011_v21, 4  ;;  %v2021_v19 = vrot.slane %v2013_v20, 4  ;;  %v2012_v35 = vmax.f32 %v1953_v23, %v2004_v31  ;;  %v2014_v29 = vmax.f32 %v1994_v41, %v2006_v25  ;;  %v5865_v25 = vld [vmem:[%s4768_s8 + $0x18] sm:$0xff] }
 0x2ad   : > { %v1956_v33 = vpop.f32.mrf.mxu0  ;;  %v1997_v28 = vpop.f32.mrf.mxu1 }
 0x2ae   : > { %v2027_v32 = vmax.f32 %v2011_v21, %v2019_v36  ;;  %v2029_v27 = vmax.f32 %v2013_v20, %v2021_v19  ;;  %v2020_v42 = vrot.slane %v2012_v35, 4  ;;  %v2022_v22 = vrot.slane %v2014_v29, 4  ;;  %v4485_v33 = vld [vmem:[%s4773_s11 + $0x640] ss:$8 sps:$4 sm:$0xff]  }
 0x2af   : > { %v4488_v28 = vld [vmem:[%s4773_s11 + $0x740] ss:$8 sps:$4 sm:$0xff]  }
 0x2b0   : > { %v2031_v37 = vadd.f32 %v2027_v32, %v5316_v39  ;;  %v2033_v24 = vadd.f32 %v2029_v27, %v5318_v40  ;;  %v2028_v30 = vmax.f32 %v2012_v35, %v2020_v42  ;;  %v2030_v34 = vmax.f32 %v2014_v29, %v2022_v22  ;;  %v4487_v22 = vld [vmem:[%s4773_s11 + $0x644] ss:$8 sps:$4 sm:$0xff]   ;;  %v4493_v32 = vld [vmem:[%s4773_s11 + $0x634] ss:$8 sps:$4 sm:$0xff]   ;;  %v4491_v42 = vld [vmem:[%s4773_s11 + $0x630] ss:$8 sps:$4 sm:$0xff]  }
 0x2b1   : > { %v3889_v35 = vcombine.high %v5865_v25, %v5865_v25  ;;  %v4490_v29 = vld [vmem:[%s4773_s11 + $0x744] ss:$8 sps:$4 sm:$0xff]   ;;  %v4496_v27 = vld [vmem:[%s4773_s11 + $0x734] ss:$8 sps:$4 sm:$0xff]  }
 0x2b2   : > { %v2032_v18 = vadd.f32 %v2028_v30, %v5321_v51  ;;  %v2034_v38 = vadd.f32 %v2030_v34, %v5323_v53  ;;  %v2035_v26 = vmax.f32 %v2031_v37, 0.0  ;;  %v2037_v23 = vmax.f32 %v2033_v24, 0.0  ;;  %v4482_v37 = vld [vmem:[%s4773_s11 + $0x750] ss:$8 sps:$4 sm:$0xff]   ;;  %v4499_v30 = vld [vmem:[%s4773_s11 + $0x624] ss:$8 sps:$4 sm:$0xff]  }
 0x2b3   : > { %v4494_v24 = vld [vmem:[%s4773_s11 + $0x730] ss:$8 sps:$4 sm:$0xff]   ;;  %v4502_v34 = vld [vmem:[%s4773_s11 + $0x724] ss:$8 sps:$4 sm:$0xff]  }
 0x2b4   : > { %v2036_v41 = vmax.f32 %v2032_v18, 0.0  ;;  %v2038_v31 = vmax.f32 %v2034_v38, 0.0  ;;  %v2039_v36 = vpack.c.bf16 %v2035_v26, %v2035_v26  ;;  %v2041_v19 = vpack.c.bf16 %v2037_v23, %v2037_v23  ;;  %v4497_v18 = vld [vmem:[%s4773_s11 + $0x620] ss:$8 sps:$4 sm:$0xff]   ;;  %v4505_v26 = vld [vmem:[%s4773_s11 + $0x614] ss:$8 sps:$4 sm:$0xff]  }
 0x2b5   : > { %v4500_v38 = vld [vmem:[%s4773_s11 + $0x720] ss:$8 sps:$4 sm:$0xff]   ;;  %v4508_v23 = vld [vmem:[%s4773_s11 + $0x714] ss:$8 sps:$4 sm:$0xff]  }
 0x2b6   : > { %v2040_v21 = vpack.c.bf16 %v2036_v41, %v2036_v41  ;;  %v2042_v20 = vpack.c.bf16 %v2038_v31, %v2038_v31  ;;  %v4503_v41 = vld [vmem:[%s4773_s11 + $0x610] ss:$8 sps:$4 sm:$0xff]  }
 0x2b7   : > { %v4506_v31 = vld [vmem:[%s4773_s11 + $0x710] ss:$8 sps:$4 sm:$0xff]  }
 0x2b8   : > { %2460 = vmatprep.mubr.bf16.mxu0 %v2040_v21  ;;  %2501 = vmatprep.mubr.bf16.mxu1 %v2042_v20  ;;  %v4514_v21 = vld [vmem:[%s4773_s11 + $0x704] ss:$8 sps:$4 sm:$0xff]   ;;  %v4509_v20 = vld [vmem:[%s4773_s11 + $0x600] ss:$8 sps:$4 sm:$0xff]  }
 0x2b9   : > { %2461 = vmatmul.mubr.bf16.vlgmr.msra.gmra.mxu0 %v2039_v36  ;;  %2502 = vmatmul.mubr.bf16.vlgmr.msra.gmra.mxu1 %v2041_v19  ;;  %v4512_v36 = vld [vmem:[%s4773_s11 + $0x700] ss:$8 sps:$4 sm:$0xff]   ;;  %v4517_v19 = vld [vmem:[%s4773_s11 + $0x6f4] ss:$8 sps:$4 sm:$0xff]  }
 0x2ba   : > { %2522 = vmatpush1.bf16.msra.mxu0 %v5419_v43  ;;  %2563 = vmatpush1.bf16.msra.mxu1 %v5425_v44  ;;  %v6206_v43 = vld [vmem:[#allocation9_spill] sm:$0xff]  ;;  %v6207_v44 = vld [vmem:[#allocation10_spill] sm:$0xff] }
 0x2bb   : > { %2523 = vmatprep.subr.bf16.mxu0 %v5431_v45  ;;  %2564 = vmatprep.subr.bf16.mxu1 %v5437_v46  ;;  %v6208_v45 = vld [vmem:[#allocation11_spill] sm:$0xff]  ;;  %v6209_v46 = vld [vmem:[#allocation12_spill] sm:$0xff] }
 0x2bc   : > { %2553 = vmatprep.mubr.bf16.mxu0 %v3889_v35  ;;  %2594 = vmatprep.mubr.bf16.mxu1 %v3889_v35  ;;  %v4520_v35 = vld [vmem:[%s4773_s11 + $0x7f4] ss:$8 sps:$4 sm:$0xff]  }
 0x2be   : > { %2524 = vmatpush1.bf16.msra.mxu0 %v5443_v47  ;;  %2565 = vmatpush1.bf16.msra.mxu1 %v5449_v48  ;;  %v6210_v47 = vld [vmem:[#allocation13_spill] sm:$0xff]  ;;  %v6211_v48 = vld [vmem:[#allocation14_spill] sm:$0xff] }
 0x2bf   : > { %2525 = vmatprep.subr.bf16.mxu0 %v5455_v49  ;;  %2566 = vmatprep.subr.bf16.mxu1 %v5461_v50  ;;  %v6212_v49 = vld [vmem:[#allocation15_spill] sm:$0xff]  ;;  %v6213_v50 = vld [vmem:[#allocation16_spill] sm:$0xff] }
 0x2c2   : > { %2526 = vmatpush1.bf16.msra.mxu0 %v5467_v54  ;;  %2567 = vmatpush1.bf16.msra.mxu1 %v5473_v55  ;;  %v6214_v54 = vld [vmem:[#allocation17_spill] sm:$0xff]  ;;  %v6215_v55 = vld [vmem:[#allocation18_spill] sm:$0xff] }
 0x2c3   : > { %2527 = vmatprep.subr.bf16.mxu0 %v5479_v56  ;;  %2568 = vmatprep.subr.bf16.mxu1 %v5485_v57  ;;  %v6216_v56 = vld [vmem:[#allocation19_spill] sm:$0xff]  ;;  %v6217_v57 = vld [vmem:[#allocation20_spill] sm:$0xff] }
 0x2c6   : > { %2528 = vmatpush1.bf16.msra.mxu0 %v5491_v58  ;;  %2569 = vmatpush1.bf16.msra.mxu1 %v5497_v59  ;;  %v6218_v58 = vld [vmem:[#allocation21_spill] sm:$0xff]  ;;  %v6219_v59 = vld [vmem:[#allocation22_spill] sm:$0xff] }
 0x2c7   : > { %2529 = vmatprep.subr.bf16.mxu0 %v5503_v60  ;;  %2570 = vmatprep.subr.bf16.mxu1 %v5509_v61  ;;  %v6220_v60 = vld [vmem:[#allocation23_spill] sm:$0xff]  ;;  %v6221_v61 = vld [vmem:[#allocation24_spill] sm:$0xff] }
 0x2ca   : > { %2530 = vmatpush1.bf16.msra.mxu0 %v5515_v62  ;;  %2571 = vmatpush1.bf16.msra.mxu1 %v5521_v63  ;;  %v6222_v62 = vld [vmem:[#allocation25_spill] sm:$0xff]  ;;  %v6223_v63 = vld [vmem:[#allocation26_spill] sm:$0xff] }
 0x2cb   : > { %2531 = vmatprep.subr.bf16.mxu0 %v5527_v0  ;;  %2572 = vmatprep.subr.bf16.mxu1 %v5533_v52  ;;  %v6224_v0 = vld [vmem:[#allocation27_spill] sm:$0xff]  ;;  %v6225_v52 = vld [vmem:[#allocation28_spill] sm:$0xff] }
 0x2ce   : > { %2532 = vmatpush1.bf16.msra.mxu0 %v5539_v1  ;;  %2573 = vmatpush1.bf16.msra.mxu1 %v5545_v2  ;;  %v6226_v1 = vld [vmem:[#allocation29_spill] sm:$0xff]  ;;  %v6227_v2 = vld [vmem:[#allocation30_spill] sm:$0xff] }
 0x2cf   : > { %2533 = vmatprep.subr.bf16.mxu0 %v5551_v3  ;;  %2574 = vmatprep.subr.bf16.mxu1 %v5557_v4  ;;  %v6228_v3 = vld [vmem:[#allocation31_spill] sm:$0xff]  ;;  %v3888_v4 = vcombine.low %v5865_v25, %v5865_v25  ;;  %v4511_v25 = vld [vmem:[%s4773_s11 + $0x604] ss:$8 sps:$4 sm:$0xff]  }
 0x2d2   : > { %2534 = vmatpush1.bf16.msra.mxu0 %v5563_v5  ;;  %2575 = vmatpush1.bf16.msra.mxu1 %v5569_v6  ;;  %v6229_v5 = vld [vmem:[#allocation32_spill] sm:$0xff]  ;;  %v6230_v6 = vld [vmem:[#allocation33_spill] sm:$0xff] }
 0x2d3   : > { %2535 = vmatprep.subr.bf16.mxu0 %v5575_v7  ;;  %2576 = vmatprep.subr.bf16.mxu1 %v5581_v10  ;;  %v4467_v7 = vld [vmem:[%s4773_s11 + $0x670] ss:$8 sps:$4 sm:$0xff]   ;;  %v4469_v10 = vld [vmem:[%s4773_s11 + $0x674] ss:$8 sps:$4 sm:$0xff]  }
 0x2d6   : > { %2536 = vmatpush1.bf16.msra.mxu0 %v5587_v11  ;;  %2577 = vmatpush1.bf16.msra.mxu1 %v5593_v12  ;;  %v4470_v11 = vld [vmem:[%s4773_s11 + $0x770] ss:$8 sps:$4 sm:$0xff]   ;;  %v4472_v12 = vld [vmem:[%s4773_s11 + $0x774] ss:$8 sps:$4 sm:$0xff]  }
 0x2d7   : > { %2537 = vmatprep.subr.bf16.mxu0 %v5599_v13  ;;  %2578 = vmatprep.subr.bf16.mxu1 %v5605_v14  ;;  %v4475_v13 = vld [vmem:[%s4773_s11 + $0x664] ss:$8 sps:$4 sm:$0xff]  }
 0x2d8   : > { %v4478_v14 = vld [vmem:[%s4773_s11 + $0x764] ss:$8 sps:$4 sm:$0xff]  }
 0x2da   : > { %2538 = vmatpush2.bf16.msra.mxu0 %v5611_v15  ;;  %2579 = vmatpush2.bf16.msra.mxu1 %v5617_v8  ;;  %v4473_v15 = vld [vmem:[%s4773_s11 + $0x660] ss:$8 sps:$4 sm:$0xff]  }
 0x2db   : > { %2539 = vmatprep.subr.bf16.mxu0 %v5623_v9  ;;  %2580 = vmatprep.subr.bf16.mxu1 %v5629_v16  ;;  %v4476_v8 = vld [vmem:[%s4773_s11 + $0x760] ss:$8 sps:$4 sm:$0xff]   ;;  %v4481_v9 = vld [vmem:[%s4773_s11 + $0x654] ss:$8 sps:$4 sm:$0xff]  }
 0x2dc   : > { %v4484_v16 = vld [vmem:[%s4773_s11 + $0x754] ss:$8 sps:$4 sm:$0xff]  }
 0x2de   : > { %2540 = vmatpush2.bf16.msra.mxu0 %v5635_v17  ;;  %2581 = vmatpush2.bf16.msra.mxu1 %v6206_v43  ;;  %v4479_v17 = vld [vmem:[%s4773_s11 + $0x650] ss:$8 sps:$4 sm:$0xff]  }
 0x2df   : > { %2541 = vmatprep.subr.bf16.mxu0 %v6207_v44  ;;  %2582 = vmatprep.subr.bf16.mxu1 %v6208_v45  ;;  %v4515_v43 = vld [vmem:[%s4773_s11 + $0x6f0] ss:$8 sps:$4 sm:$0xff]   ;;  %v4523_v45 = vld [vmem:[%s4773_s11 + $0x6e4] ss:$8 sps:$4 sm:$0xff]  }
 0x2e0   : > { %v4518_v44 = vld [vmem:[%s4773_s11 + $0x7f0] ss:$8 sps:$4 sm:$0xff]  }
 0x2e2   : > { %2542 = vmatpush2.bf16.msra.mxu0 %v6209_v46  ;;  %2583 = vmatpush2.bf16.msra.mxu1 %v6210_v47  ;;  %v4526_v46 = vld [vmem:[%s4773_s11 + $0x7e4] ss:$8 sps:$4 sm:$0xff]   ;;  %v4521_v47 = vld [vmem:[%s4773_s11 + $0x6e0] ss:$8 sps:$4 sm:$0xff]  }
 0x2e3   : > { %2543 = vmatprep.subr.bf16.mxu0 %v6211_v48  ;;  %2584 = vmatprep.subr.bf16.mxu1 %v6212_v49  ;;  %v4524_v48 = vld [vmem:[%s4773_s11 + $0x7e0] ss:$8 sps:$4 sm:$0xff]   ;;  %v4529_v49 = vld [vmem:[%s4773_s11 + $0x6d4] ss:$8 sps:$4 sm:$0xff]  }
 0x2e6   : > { %2544 = vmatpush2.bf16.msra.mxu0 %v6213_v50  ;;  %2585 = vmatpush2.bf16.msra.mxu1 %v6214_v54  ;;  %v4532_v50 = vld [vmem:[%s4773_s11 + $0x7d4] ss:$8 sps:$4 sm:$0xff]   ;;  %v4527_v54 = vld [vmem:[%s4773_s11 + $0x6d0] ss:$8 sps:$4 sm:$0xff]  }
 0x2e7   : > { %2545 = vmatprep.subr.bf16.mxu0 %v6215_v55  ;;  %2586 = vmatprep.subr.bf16.mxu1 %v6216_v56  ;;  %v4530_v55 = vld [vmem:[%s4773_s11 + $0x7d0] ss:$8 sps:$4 sm:$0xff]   ;;  %v4535_v56 = vld [vmem:[%s4773_s11 + $0x6c4] ss:$8 sps:$4 sm:$0xff]  }
 0x2ea   : > { %2546 = vmatpush2.bf16.msra.mxu0 %v6217_v57  ;;  %2587 = vmatpush2.bf16.msra.mxu1 %v6218_v58  ;;  %v4538_v57 = vld [vmem:[%s4773_s11 + $0x7c4] ss:$8 sps:$4 sm:$0xff]   ;;  %v4533_v58 = vld [vmem:[%s4773_s11 + $0x6c0] ss:$8 sps:$4 sm:$0xff]  }
 0x2eb   : > { %2547 = vmatprep.subr.bf16.mxu0 %v6219_v59  ;;  %2588 = vmatprep.subr.bf16.mxu1 %v6220_v60  ;;  %v4536_v59 = vld [vmem:[%s4773_s11 + $0x7c0] ss:$8 sps:$4 sm:$0xff]   ;;  %v4541_v60 = vld [vmem:[%s4773_s11 + $0x6b4] ss:$8 sps:$4 sm:$0xff]  }
 0x2ee   : > { %2548 = vmatpush2.bf16.msra.mxu0 %v6221_v61  ;;  %2589 = vmatpush2.bf16.msra.mxu1 %v6222_v62  ;;  %v4544_v61 = vld [vmem:[%s4773_s11 + $0x7b4] ss:$8 sps:$4 sm:$0xff]   ;;  %v4539_v62 = vld [vmem:[%s4773_s11 + $0x6b0] ss:$8 sps:$4 sm:$0xff]  }
 0x2ef   : > { %2549 = vmatprep.subr.bf16.mxu0 %v6223_v63  ;;  %2590 = vmatprep.subr.bf16.mxu1 %v6224_v0  ;;  %v4542_v63 = vld [vmem:[%s4773_s11 + $0x7b0] ss:$8 sps:$4 sm:$0xff]   ;;  %v4547_v0 = vld [vmem:[%s4773_s11 + $0x6a4] ss:$8 sps:$4 sm:$0xff]  }
 0x2f2   : > { %2550 = vmatpush2.bf16.msra.mxu0 %v6225_v52  ;;  %2591 = vmatpush2.bf16.msra.mxu1 %v6226_v1  ;;  %v4550_v52 = vld [vmem:[%s4773_s11 + $0x7a4] ss:$8 sps:$4 sm:$0xff]   ;;  %v4545_v1 = vld [vmem:[%s4773_s11 + $0x6a0] ss:$8 sps:$4 sm:$0xff]  }
 0x2f3   : > { %2551 = vmatprep.subr.bf16.mxu0 %v6227_v2  ;;  %2592 = vmatprep.subr.bf16.mxu1 %v6228_v3  ;;  %v4548_v2 = vld [vmem:[%s4773_s11 + $0x7a0] ss:$8 sps:$4 sm:$0xff]   ;;  %v4553_v3 = vld [vmem:[%s4773_s11 + $0x694] ss:$8 sps:$4 sm:$0xff]  }
 0x2f6   : > { %2552 = vmatpush2.bf16.msra.mxu0 %v6229_v5  ;;  %2593 = vmatpush2.bf16.msra.mxu1 %v6230_v6  ;;  %v4551_v5 = vld [vmem:[%s4773_s11 + $0x690] ss:$8 sps:$4 sm:$0xff]  }
 0x2f7   : > { %3032 = vmatprep.subr.bf16.mxu0 %v4469_v10  ;;  %3073 = vmatprep.subr.bf16.mxu1 %v4472_v12  ;;  %v4554_v6 = vld [vmem:[%s4773_s11 + $0x790] ss:$8 sps:$4 sm:$0xff]   ;;  %v4562_v10 = vld [vmem:[%s4773_s11 + $0x784] ss:$8 sps:$4 sm:$0xff]   ;;  %v4560_v12 = vld [vmem:[%s4773_s11 + $0x780] ss:$8 sps:$4 sm:$0xff]  }
 0x2f9   : > { %2554 = vmatmul.mubr.bf16.vlgmr.msra.gmra.mxu0 %v3888_v4  ;;  %2595 = vmatmul.mubr.bf16.vlgmr.msra.gmra.mxu1 %v3888_v4  ;;  %v4556_v4 = vld [vmem:[%s4773_s11 + $0x794] ss:$8 sps:$4 sm:$0xff]  }
 0x2fa   : > { %3033 = vmatpush1.bf16.msra.mxu0 %v4467_v7  ;;  %3074 = vmatpush1.bf16.msra.mxu1 %v4470_v11  ;;  %v4559_v7 = vld [vmem:[%s4773_s11 + $0x684] ss:$8 sps:$4 sm:$0xff]   ;;  %v4557_v11 = vld [vmem:[%s4773_s11 + $0x680] ss:$8 sps:$4 sm:$0xff]  }
 0x2fb   : > { %3034 = vmatprep.subr.bf16.mxu0 %v4475_v13  ;;  %3075 = vmatprep.subr.bf16.mxu1 %v4478_v14 }
 0x2fe   : > { %3035 = vmatpush1.bf16.msra.mxu0 %v4473_v15  ;;  %3076 = vmatpush1.bf16.msra.mxu1 %v4476_v8 }
 0x2ff   : > { %3036 = vmatprep.subr.bf16.mxu0 %v4481_v9  ;;  %3077 = vmatprep.subr.bf16.mxu1 %v4484_v16  ;;  %v6231_v16 = vld [vmem:[#allocation34_spill] sm:$0xff] }
 0x302   : > { %3037 = vmatpush1.bf16.msra.mxu0 %v4479_v17  ;;  %3078 = vmatpush1.bf16.msra.mxu1 %v4482_v37 }
 0x303   : > { %3038 = vmatprep.subr.bf16.mxu0 %v4487_v22  ;;  %3079 = vmatprep.subr.bf16.mxu1 %v4490_v29 }
 0x306   : > { %3039 = vmatpush1.bf16.msra.mxu0 %v4485_v33  ;;  %3080 = vmatpush1.bf16.msra.mxu1 %v4488_v28  ;;  %v6232_v33 = vld [vmem:[#allocation35_spill] sm:$0xff] }
 0x307   : > { %3040 = vmatprep.subr.bf16.mxu0 %v4493_v32  ;;  %3081 = vmatprep.subr.bf16.mxu1 %v4496_v27 }
 0x30a   : > { %3041 = vmatpush1.bf16.msra.mxu0 %v4491_v42  ;;  %3082 = vmatpush1.bf16.msra.mxu1 %v4494_v24 }
 0x30b   : > { %3042 = vmatprep.subr.bf16.mxu0 %v4499_v30  ;;  %3083 = vmatprep.subr.bf16.mxu1 %v4502_v34 }
 0x30e   : > { %3043 = vmatpush1.bf16.msra.mxu0 %v4497_v18  ;;  %3084 = vmatpush1.bf16.msra.mxu1 %v4500_v38 }
 0x30f   : > { %3044 = vmatprep.subr.bf16.mxu0 %v4505_v26  ;;  %3085 = vmatprep.subr.bf16.mxu1 %v4508_v23 }
 0x312   : > { %3045 = vmatpush1.bf16.msra.mxu0 %v4503_v41  ;;  %3086 = vmatpush1.bf16.msra.mxu1 %v4506_v31 }
 0x313   : > { %3046 = vmatprep.subr.bf16.mxu0 %v4511_v25  ;;  %3087 = vmatprep.subr.bf16.mxu1 %v4514_v21 }
 0x316   : > { %3047 = vmatpush1.bf16.msra.mxu0 %v4509_v20  ;;  %3088 = vmatpush1.bf16.msra.mxu1 %v4512_v36 }
 0x317   : > { %3048 = vmatprep.subr.bf16.mxu0 %v4517_v19  ;;  %3089 = vmatprep.subr.bf16.mxu1 %v4520_v35 }
 0x31a   : > { %3049 = vmatpush2.bf16.msra.mxu0 %v4515_v43  ;;  %3090 = vmatpush2.bf16.msra.mxu1 %v4518_v44 }
 0x31b   : > { %3050 = vmatprep.subr.bf16.mxu0 %v4523_v45  ;;  %3091 = vmatprep.subr.bf16.mxu1 %v4526_v46 }
 0x31e   : > { %3051 = vmatpush2.bf16.msra.mxu0 %v4521_v47  ;;  %3092 = vmatpush2.bf16.msra.mxu1 %v4524_v48 }
 0x31f   : > { %3052 = vmatprep.subr.bf16.mxu0 %v4529_v49  ;;  %3093 = vmatprep.subr.bf16.mxu1 %v4532_v50 }
 0x322   : > { %3053 = vmatpush2.bf16.msra.mxu0 %v4527_v54  ;;  %3094 = vmatpush2.bf16.msra.mxu1 %v4530_v55 }
 0x323   : > { %3054 = vmatprep.subr.bf16.mxu0 %v4535_v56  ;;  %3095 = vmatprep.subr.bf16.mxu1 %v4538_v57 }
 0x326   : > { %3055 = vmatpush2.bf16.msra.mxu0 %v4533_v58  ;;  %3096 = vmatpush2.bf16.msra.mxu1 %v4536_v59 }
 0x327   : > { %3056 = vmatprep.subr.bf16.mxu0 %v4541_v60  ;;  %3097 = vmatprep.subr.bf16.mxu1 %v4544_v61 }
 0x32a   : > { %3057 = vmatpush2.bf16.msra.mxu0 %v4539_v62  ;;  %3098 = vmatpush2.bf16.msra.mxu1 %v4542_v63 }
 0x32b   : > { %3058 = vmatprep.subr.bf16.mxu0 %v4547_v0  ;;  %3099 = vmatprep.subr.bf16.mxu1 %v4550_v52 }
 0x32e   : > { %3059 = vmatpush2.bf16.msra.mxu0 %v4545_v1  ;;  %3100 = vmatpush2.bf16.msra.mxu1 %v4548_v2 }
 0x32f   : > { %3060 = vmatprep.subr.bf16.mxu0 %v4553_v3  ;;  %3101 = vmatprep.subr.bf16.mxu1 %v4556_v4 }
 0x332   : > { %3061 = vmatpush2.bf16.msra.mxu0 %v4551_v5  ;;  %3102 = vmatpush2.bf16.msra.mxu1 %v4554_v6 }
 0x333   : > { %3062 = vmatprep.subr.bf16.mxu0 %v4559_v7  ;;  %3103 = vmatprep.subr.bf16.mxu1 %v4562_v10 }
 0x336   : > { %3063 = vmatpush2.bf16.msra.mxu0 %v4557_v11  ;;  %3104 = vmatpush2.bf16.msra.mxu1 %v4560_v12  ;;  %v6233_v12 = vld [vmem:[#allocation6_spill] sm:$0xff] }
 0x379   : > { %v2462_v13 = vpop.f32.mrf.mxu0  ;;  %v2503_v14 = vpop.f32.mrf.mxu1 }
 0x37a   : > { %v2504_v15 = vadd.f32 %v2503_v14, %v2462_v13 }
 0x37b   : > { %v2464_v8 = vpop.f32.mrf.mxu0  ;;  %v2505_v9 = vpop.f32.mrf.mxu1 }
 0x37c   : > { %v2510_v17 = vadd.f32 %v2504_v15, %v6231_v16  ;;  %v2506_v37 = vadd.f32 %v2505_v9, %v2464_v8  ;;  %v3116_v9 = vld [vmem:[#allocation2] sm:$0xf] }
 0x37d   : > { %v2466_v22 = vpop.f32.mrf.mxu0  ;;  %v2507_v29 = vpop.f32.mrf.mxu1 }
 0x37e   : > { %v2511_v28 = vadd.f32 %v2506_v37, %v6232_v33 }
 0x37f   : > { %v2467_v32 = vpop.f32.mrf.mxu0  ;;  %v2508_v27 = vpop.f32.mrf.mxu1 }
 0x3b9   : > { %v2555_v42 = vpop.f32.mrf.mxu0  ;;  %v2596_v24 = vpop.f32.mrf.mxu1 }
 0x3ba   : > { %v2607_v30 = vrot.slane %v2555_v42, 2  ;;  %v2609_v34 = vrot.slane %v2596_v24, 2 }
 0x3bb   : > { %v2557_v18 = vpop.f32.mrf.mxu0  ;;  %v2598_v38 = vpop.f32.mrf.mxu1 }
 0x3bc   : > { %v2615_v26 = vmax.f32 %v2555_v42, %v2607_v30  ;;  %v2617_v23 = vmax.f32 %v2596_v24, %v2609_v34  ;;  %v2608_v41 = vrot.slane %v2557_v18, 2  ;;  %v2610_v31 = vrot.slane %v2598_v38, 2 }
 0x3bd   : > { %v2559_v25 = vpop.f32.mrf.mxu0  ;;  %v2600_v21 = vpop.f32.mrf.mxu1 }
 0x3be   : > { %v2623_v20 = vrot.slane %v2615_v26, 4  ;;  %v2625_v36 = vrot.slane %v2617_v23, 4  ;;  %v2616_v19 = vmax.f32 %v2557_v18, %v2608_v41  ;;  %v2618_v35 = vmax.f32 %v2598_v38, %v2610_v31 }
 0x3bf   : > { %v2560_v43 = vpop.f32.mrf.mxu0  ;;  %v2601_v44 = vpop.f32.mrf.mxu1 }
 0x3c0   : > { %v2631_v45 = vmax.f32 %v2615_v26, %v2623_v20  ;;  %v2633_v46 = vmax.f32 %v2617_v23, %v2625_v36  ;;  %v2624_v47 = vrot.slane %v2616_v19, 4  ;;  %v2626_v48 = vrot.slane %v2618_v35, 4 }
 0x3c2   : > { %v2635_v49 = vadd.f32 %v2631_v45, %v5316_v39  ;;  %v2637_v50 = vadd.f32 %v2633_v46, %v5318_v40  ;;  %v2632_v54 = vmax.f32 %v2616_v19, %v2624_v47  ;;  %v2634_v55 = vmax.f32 %v2618_v35, %v2626_v48 }
 0x3c3   : > { %v4712_v39 = vmov 1983009808  }
 0x3c4   : > { %v2636_v56 = vadd.f32 %v2632_v54, %v5321_v51  ;;  %v2638_v57 = vadd.f32 %v2634_v55, %v5323_v53  ;;  %v2639_v58 = vmax.f32 %v2635_v49, 0.0  ;;  %v2641_v59 = vmax.f32 %v2637_v50, 0.0 }
 0x3c5   : > { %v3121_v40 = vunpack.c.l.s4 %v4712_v39 }
 0x3c6   : > { %v2640_v60 = vmax.f32 %v2636_v56, 0.0  ;;  %v2642_v61 = vmax.f32 %v2638_v57, 0.0  ;;  %v2643_v0 = vpack.c.bf16 %v2639_v58, %v2639_v58  ;;  %v2645_v52 = vpack.c.bf16 %v2641_v59, %v2641_v59 }
 0x3c7   : > { %v3122_v51 = vunpack.c.0.s8 %v3121_v40 }
 0x3c8   : > { %v2644_v62 = vpack.c.bf16 %v2640_v60, %v2640_v60  ;;  %v2646_v63 = vpack.c.bf16 %v2642_v61, %v2642_v61 }
 0x3c9   : > { %v3125_v13 = vsub.s32 %v3122_v51, %v6233_v12 }
 0x3ca   : > { %3064 = vmatprep.mubr.bf16.mxu0 %v2644_v62  ;;  %3105 = vmatprep.mubr.bf16.mxu1 %v2646_v63 }
 0x3cb   : > { %3065 = vmatmul.mubr.bf16.vlgmr.msra.gmra.mxu0 %v2643_v0  ;;  %3106 = vmatmul.mubr.bf16.vlgmr.msra.gmra.mxu1 %v2645_v52 }
 0x48b   : > { %v3066_v1 = vpop.f32.mrf.mxu0  ;;  %v3107_v2 = vpop.f32.mrf.mxu1 }
 0x48c   : > { %v3108_v3 = vadd.f32 %v3107_v2, %v3066_v1 }
 0x48d   : > { %v3068_v4 = vpop.f32.mrf.mxu0  ;;  %v3109_v53 = vpop.f32.mrf.mxu1 }
 0x48e   : > { %v3110_v5 = vadd.f32 %v3109_v53, %v3068_v4  ;;  %v3114_v10 = vadd.f32 %v3108_v3, %v2510_v17 }
 0x48f   : > { %v3070_v6 = vpop.f32.mrf.mxu0  ;;  %v3111_v7 = vpop.f32.mrf.mxu1 }
 0x490   : > { %v3115_v11 = vadd.f32 %v3110_v5, %v2511_v28 }
 0x491   : > { %v3071_v14 = vpop.f32.mrf.mxu0  ;;  %v3112_v15 = vpop.f32.mrf.mxu1 }
 0x492   : > { %v3119_v8 = vcombine.low %v3114_v10, %v3115_v11 }
 0x494   : > { %v3126_v16 = vrot.slane %v3119_v8, %v3125_v13  ;;  %3133 = sbr.rel (%p4018_p5) target bundleno = 1442 (0x5a2), region = 56 }
 0x496   : > { %v3128_v37 = vadd.f32 %v3126_v16, %v3116_v9 }
 0x498   : > { %3129 = vst [vmem:[#allocation2] sm:$0xf] %v3128_v37 }
 0x499   : > { %v4627_v22 = vld [vmem:[%s6131_s5 + $0x74] ss:$8 sps:$4 sm:$0xff]   ;;  %v4629_v17 = vld [vmem:[%s6131_s5 + $0x70] ss:$8 sps:$4 sm:$0xff]   ;;  %v4630_v29 = vld [vmem:[%s6131_s5 + $0x64] ss:$8 sps:$4 sm:$0xff]  }
 0x49a   : > { %3373 = vmatprep.subr.bf16.mxu0 %v4627_v22  ;;  %v4632_v33 = vld [vmem:[%s6131_s5 + $0x60] ss:$8 sps:$4 sm:$0xff]   ;;  %v4633_v28 = vld [vmem:[%s6131_s5 + $0x54] ss:$8 sps:$4 sm:$0xff]   ;;  %v4635_v32 = vld [vmem:[%s6131_s5 + $0x50] ss:$8 sps:$4 sm:$0xff]  }
 0x49b   : > { %3374 = vmatpush1.bf16.msra.mxu0 %v4629_v17  ;;  %v4636_v27 = vld [vmem:[%s6131_s5 + $0x44] ss:$8 sps:$4 sm:$0xff]   ;;  %v4638_v42 = vld [vmem:[%s6131_s5 + $0x40] ss:$8 sps:$4 sm:$0xff]   ;;  %v4639_v24 = vld [vmem:[%s6131_s5 + $0x34] ss:$8 sps:$4 sm:$0xff]  }
 0x49c   : > { %3375 = vmatprep.subr.bf16.mxu0 %v4630_v29  ;;  %v4641_v30 = vld [vmem:[%s6131_s5 + $0x30] ss:$8 sps:$4 sm:$0xff]   ;;  %v4642_v34 = vld [vmem:[%s6131_s5 + $0x24] ss:$8 sps:$4 sm:$0xff]   ;;  %v4644_v18 = vld [vmem:[%s6131_s5 + $0x20] ss:$8 sps:$4 sm:$0xff]  }
 0x49d   : > { %v4645_v38 = vld [vmem:[%s6131_s5 + $0x14] ss:$8 sps:$4 sm:$0xff]   ;;  %v3135_v26 = vld [vmem:[%s6130_s4] sm:$0x3]  ;;  %v4647_v21 = vld [vmem:[%s6131_s5 + $0x10] ss:$8 sps:$4 sm:$0xff]  }
 0x49e   : > { %v6234_v23 = vld [vmem:[#allocation7_spill] sm:$0xff]  ;;  %v6235_v31 = vld [vmem:[#allocation8_spill] sm:$0xff]  ;;  %v4648_v20 = vld [vmem:[%s6131_s5 + $0x4] ss:$8 sps:$4 sm:$0xff]  }
 0x49f   : > { %3376 = vmatpush1.bf16.msra.mxu0 %v4632_v33  ;;  %v3140_v41 = vrot.slane %v3135_v26, %v6234_v23  ;;  %v3144_v25 = vrot.slane %v3135_v26, %v6235_v31  ;;  %v3134_v19 = vld [vmem:[#allocation2] sm:$0xf]  ;;  %v4651_v44 = vld [vmem:[%s6131_s5 + $0xf4] ss:$8 sps:$4 sm:$0xff]   ;;  %v4653_v47 = vld [vmem:[%s6131_s5 + $0xf0] ss:$8 sps:$4 sm:$0xff]  }
 0x4a0   : > { %3377 = vmatprep.subr.bf16.mxu0 %v4633_v28  ;;  %v4650_v43 = vld [vmem:[%s6131_s5] ss:$8 sps:$4 sm:$0xff]   ;;  %v4654_v48 = vld [vmem:[%s6131_s5 + $0xe4] ss:$8 sps:$4 sm:$0xff]   ;;  %v4657_v55 = vld [vmem:[%s6131_s5 + $0xd4] ss:$8 sps:$4 sm:$0xff]  }
 0x4a1   : > { %v3145_v36 = vcombine.low %v3140_v41, %v3144_v25  ;;  %v4656_v54 = vld [vmem:[%s6131_s5 + $0xe0] ss:$8 sps:$4 sm:$0xff]   ;;  %v4659_v57 = vld [vmem:[%s6131_s5 + $0xd0] ss:$8 sps:$4 sm:$0xff]   ;;  %v4660_v58 = vld [vmem:[%s6131_s5 + $0xc4] ss:$8 sps:$4 sm:$0xff]  }
 0x4a2   : > { %v4662_v59 = vld [vmem:[%s6131_s5 + $0xc0] ss:$8 sps:$4 sm:$0xff]   ;;  %v4663_v60 = vld [vmem:[%s6131_s5 + $0xb4] ss:$8 sps:$4 sm:$0xff]   ;;  %v4665_v61 = vld [vmem:[%s6131_s5 + $0xb0] ss:$8 sps:$4 sm:$0xff]  }
 0x4a3   : > { %3378 = vmatpush1.bf16.msra.mxu0 %v4635_v32  ;;  %v3152_v35 = vrot.slane %v3145_v36, %v3125_v13  ;;  %v4666_v62 = vld [vmem:[%s6131_s5 + $0xa4] ss:$8 sps:$4 sm:$0xff]   ;;  %v4668_v63 = vld [vmem:[%s6131_s5 + $0xa0] ss:$8 sps:$4 sm:$0xff]   ;;  %v4669_v0 = vld [vmem:[%s6131_s5 + $0x94] ss:$8 sps:$4 sm:$0xff]  }
 0x4a4   : > { %3379 = vmatprep.subr.bf16.mxu0 %v4636_v27  ;;  %v4671_v52 = vld [vmem:[%s6131_s5 + $0x90] ss:$8 sps:$4 sm:$0xff]   ;;  %v4672_v39 = vld [vmem:[%s6131_s5 + $0x84] ss:$8 sps:$4 sm:$0xff]   ;;  %v4674_v40 = vld [vmem:[%s6131_s5 + $0x80] ss:$8 sps:$4 sm:$0xff]  }
 0x4a5   : > { %v3154_v45 = vadd.f32 %v3152_v35, %v3134_v19  ;;  %v3201_v2 = vld [vmem:[%s6132_s6] sm:$0x3] }
 0x4a6   : > { %v3206_v3 = vrot.slane %v3201_v2, %v6234_v23  ;;  %v3210_v51 = vrot.slane %v3201_v2, %v6235_v31 }
 0x4a7   : > { %3380 = vmatpush1.bf16.msra.mxu0 %v4638_v42  ;;  %v3155_v46 = vmax.f32 %v3154_v45, 0.0 }
 0x4a8   : > { %3381 = vmatprep.subr.bf16.mxu0 %v4639_v24 }
 0x4a9   : > { %v3163_v49 = vrot.slane %v3155_v46, %v3125_v13 }
 0x4ab   : > { %3382 = vmatpush1.bf16.msra.mxu0 %v4641_v30  ;;  %v3164_v50 = vcombine.high %v3163_v49, %v3163_v49  ;;  %v3167_v1 = vpack.c.bf16 %v3163_v49, %v3163_v49 }
 0x4ac   : > { %3383 = vmatprep.subr.bf16.mxu0 %v4642_v34 }
 0x4ad   : > { %v3168_v56 = vpack.c.bf16 %v3164_v50, %v3164_v50 }
 0x4af   : > { %3384 = vmatpush1.bf16.msra.mxu0 %v4644_v18  ;;  %3405 = vmatprep.mubr.bf16.mxu0 %v3168_v56 }
 0x4b0   : > { %3385 = vmatprep.subr.bf16.mxu0 %v4645_v38 }
 0x4b3   : > { %3386 = vmatpush1.bf16.msra.mxu0 %v4647_v21 }
 0x4b4   : > { %3387 = vmatprep.subr.bf16.mxu0 %v4648_v20 }
 0x4b7   : > { %3388 = vmatpush1.bf16.msra.mxu0 %v4650_v43 }
 0x4b8   : > { %3389 = vmatprep.subr.bf16.mxu0 %v4651_v44 }
 0x4bb   : > { %3390 = vmatpush2.bf16.msra.mxu0 %v4653_v47 }
 0x4bc   : > { %3391 = vmatprep.subr.bf16.mxu0 %v4654_v48 }
 0x4bf   : > { %3392 = vmatpush2.bf16.msra.mxu0 %v4656_v54 }
 0x4c0   : > { %3393 = vmatprep.subr.bf16.mxu0 %v4657_v55 }
 0x4c3   : > { %3394 = vmatpush2.bf16.msra.mxu0 %v4659_v57 }
 0x4c4   : > { %3395 = vmatprep.subr.bf16.mxu0 %v4660_v58 }
 0x4c7   : > { %3396 = vmatpush2.bf16.msra.mxu0 %v4662_v59 }
 0x4c8   : > { %3397 = vmatprep.subr.bf16.mxu0 %v4663_v60 }
 0x4cb   : > { %3398 = vmatpush2.bf16.msra.mxu0 %v4665_v61 }
 0x4cc   : > { %3399 = vmatprep.subr.bf16.mxu0 %v4666_v62 }
 0x4cf   : > { %3400 = vmatpush2.bf16.msra.mxu0 %v4668_v63 }
 0x4d0   : > { %3401 = vmatprep.subr.bf16.mxu0 %v4669_v0 }
 0x4d3   : > { %3402 = vmatpush2.bf16.msra.mxu0 %v4671_v52 }
 0x4d4   : > { %3403 = vmatprep.subr.bf16.mxu0 %v4672_v39 }
 0x4d7   : > { %3404 = vmatpush2.bf16.msra.mxu0 %v4674_v40 }
 0x4da   : > { %3406 = vmatmul.mubr.bf16.vlgmr.msra.gmra.mxu0 %v3167_v1 }
 0x59a   : > { %v3407_v4 = vpop.f32.mrf.mxu0 }
 0x59b   : > { %v3408_v5 = vadd.f32 %v3407_v4, %v3206_v3 }
 0x59c   : > { %v3409_v53 = vpop.f32.mrf.mxu0 }
 0x59d   : > { %v3410_v6 = vadd.f32 %v3409_v53, %v3210_v51 }
 0x59e   : > { %v3411_v7 = vpop.f32.mrf.mxu0 }
 0x59f   : > { %v3416_v10 = vcombine.low %v3408_v5, %v3410_v6 }
 0x5a0   : > { %v3412_v11 = vpop.f32.mrf.mxu0 }
 0x5a1   : > { %4051 = vst.sshfl [vmem:[#allocation3] sm:$0x33 pattern:$0x76325410] %v3416_v10 }
 0x5a2 PF: > { %p4062_p6 = scmp.eq.s32.totalorder %s4760_s25, 1  ;;  %s4713_s28 = smov [#allocation3]  }
 0x5a3   : > { %s3433_s29 = sshll.u32 %s4713_s28, 4  ;;  %s3434_s29 = int_to_ptr.vmem [resolvable:$true] %s3433_s29 }
 0x5a4   : > { %s4675_s30 = scalar_lea.vmem %s3434_s29, 64  ;;  %p4682_p10 = scmp.lt.s32.totalorder %s3434_s29, %s3434_s29 }
 0x5a5   : > { %p4676_p7 = scmp.ne.s32.totalorder %s3434_s29, %s4675_s30  ;;  %p4683_p11 = scmp.lt.s32.totalorder %s4675_s30, %s4675_s30 }
 0x5a7   : > { %p4677_p8 = pnand %p4676_p7, %p4062_p6  ;;  %p4684_p12 = por %p4683_p11, %p4682_p10 }
 0x5a9   : > { %p4678_p9 = pneg %p4677_p8 }
 0x5ab   : > { %p4685_p13 = pnand %p4684_p12, %p4678_p9 }
 0x5ad   : > { %4688 = shalt.err (!%p4685_p13)
}
 0x5ae   : > { %4059 = dma.vmem_to_hbm [thread:$0]  (%p4062_p6), %s3434_s29, 64, %s6133_s7, [#allocation4]  }
 0x5af   : > { %4704 = dma.done.wait (%p4062_p6), [#allocation4], 64  }
 0x5b0   : > { %4706 = vsyncadd (%p4062_p6), [#allocation4], 4294967232 }
 0x5b1 PF: > { %s18_s24 = sadd.s32 1, %s4709_s24  }
 0x5b2   : > { %p15_p0 = scmp.ge.s32.totalorder %s18_s24, 4  }
 0x5b4   :  { %17 = sbr.rel (!%p15_p0) target bundleno = 1 (0x1), region = 92 }
 0x5b9   :  { %3446 = vsyncpa [#allocation4], 1 }
 0x5ba   :  { %3448 = vsyncpa [#allocation4 + $0x1], 1 }

</bundles_post_ra>
